<compile_context>
chip_gen: v7x
topology: tpu7x:2x2x1
jax: 0.10.0
libtpu: 0.0.40
codegen_flags: <defaults>
</compile_context>

<pallas_src>
import jax
import jax.numpy as jnp
from jax.experimental import pallas as pl
from jax.experimental.pallas import tpu as pltpu


# --------------------------------------------------------------------------- #
# Fused kernel: per-point MLP + running max + FC head
# --------------------------------------------------------------------------- #
def stn_kernel(x_ref, w1, b1, w2, b2, w3, b3, w4, b4, w5, b5, w6, b6i,
               out_ref, gmax_ref):
    k = pl.program_id(1)                     # N-tile index (reduction axis)
    bt, nt, d = x_ref.shape
    rows = bt * nt
    co3 = gmax_ref.shape[-1]                 # 1024

    # ---- layer 1 (d -> 64): K = d is tiny, so keep it OFF the MXU and do d
    #      broadcast multiply-adds on the VPU (f32).
    x = x_ref[...].reshape(rows, d)                                  # (rows, d) f32
    w1v = w1[...]                                                    # (d, 64)  f32
    acc1 = b1[...] + x[:, 0:1] * w1v[0:1, :]
    for c in range(1, d):                                            # d is static
        acc1 = acc1 + x[:, c:c + 1] * w1v[c:c + 1, :]
    h = jnp.maximum(acc1, 0.0).astype(jnp.bfloat16)                  # (rows, 64)

    # ---- layer 2 (64 -> 128): MXU
    h = jnp.dot(h, w2[...], preferred_element_type=jnp.float32) + b2[...]
    h = jnp.maximum(h, 0.0).astype(jnp.bfloat16)                     # (rows, 128)

    # ---- layer 3 (128 -> 1024): MXU, *raw* scores only.  Per-channel bias and
    #      ReLU are hoisted past the max (they commute with it).
    s3 = jnp.dot(h, w3[...], preferred_element_type=jnp.float32)     # (rows, 1024) f32
    m = jnp.max(s3.reshape(bt, nt, co3), axis=1)                     # (bt, 1024)

    @pl.when(k == 0)
    def _():
        gmax_ref[...] = m

    @pl.when(k > 0)
    def _():
        gmax_ref[...] = jnp.maximum(gmax_ref[...], m)

    # ---- last N-tile: apply hoisted bias+ReLU exactly once, then the FC head.
    @pl.when(k == pl.num_programs(1) - 1)
    def _():
        g = jnp.maximum(gmax_ref[...] + b3[...], 0.0).astype(jnp.bfloat16)

        def lin_relu(v, w_r, b_r):
            y = jnp.dot(v, w_r[...], preferred_element_type=jnp.float32) + b_r[...]
            return jnp.maximum(y, 0.0).astype(jnp.bfloat16)

        f = lin_relu(g, w4, b4)                                      # (bt, 512)
        f = lin_relu(f, w5, b5)                                      # (bt, 256)
        o = jnp.dot(f, w6[...], preferred_element_type=jnp.float32) + b6i[...]
        out_ref[...] = o.reshape(bt, 1, o.shape[-1])                 # (bt, 1, d*d)


# --------------------------------------------------------------------------- #
# Parameter setup (BN folded, eval statistics)
# --------------------------------------------------------------------------- #
def init_params(key, d):
    """Deterministic synthetic parameters; BN (inference mode) folded in."""
    eps = 1e-5
    dims = [(d, 64), (64, 128), (128, 1024), (1024, 512), (512, 256), (256, d * d)]
    keys = jax.random.split(key, len(dims))
    params = []
    for k, (ci, co) in zip(keys, dims):
        kw, kb = jax.random.split(k)
        w = jax.random.normal(kw, (ci, co), jnp.float32) * 0.05
        b = jax.random.normal(kb, (co,), jnp.float32) * 0.05
        params.append((w, b))
    # BN fold: y = (xW + b) * scale + shift; scale = 1/sqrt(1+eps), shift = 0
    # (default-initialized BN, eval statistics).  scale > 0, commutes with ReLU.
    # TODO(synk): for trained BN stats, fold per-channel scale/shift here instead.
    scale = 1.0 / jnp.sqrt(1.0 + eps)
    folded = []
    for i, (w, b) in enumerate(params):
        if i < 5:  # first 5 layers are followed by a BatchNorm
            folded.append((w * scale, b * scale))
        else:
            folded.append((w, b))
    return folded


# --------------------------------------------------------------------------- #
# Tiling helpers
# --------------------------------------------------------------------------- #
def _largest_divisor_leq(total, cap, multiple=1):
    """Largest divisor of `total` that is <= cap and a multiple of `multiple`."""
    best = None
    t = multiple
    while t <= cap:
        if total % t == 0:
            best = t
        t += multiple
    return best


def _choose_tiles(B, N, rows_target):
    # Batch tile: keep >= 2 blocks on the parallel axis whenever B >= 2 so the
    # second TensorCore on v7x gets work (no effect on single-TC v5e/v6e).
    if B >= 2:
        cap = max(1, min(8, B // 2))
        bt = _largest_divisor_leq(B, cap) or 1
    else:
        bt = 1
    # Point tile: ~rows_target matmul rows per grid step, lane/sublane aligned.
    target = max(8, rows_target // bt)
    if N <= target:
        nt = N
    else:
        nt = (_largest_divisor_leq(N, target, 128)
              or _largest_divisor_leq(N, target, 8)
              or N)   # awkward N: full-extent block (legal; rare)
    return bt, nt


def _vmem_and_rows():
    """Per-generation VMEM budget & row-tile target (v7x has only 64 MiB/TC)."""
    try:
        cap = pltpu.get_tpu_info().vmem_capacity_bytes
    except Exception:
        cap = 64 * 1024 * 1024
    if cap >= 96 * 1024 * 1024:          # v5e / v6e: 128 MiB physical VMEM
        return 64 * 1024 * 1024, 4096
    return 48 * 1024 * 1024, 2048        # v7x: 64 MiB per TensorCore


# --------------------------------------------------------------------------- #
# Forward wrapper
# --------------------------------------------------------------------------- #
def stn_forward(x_bdn, params, d):
    """x_bdn: (B, d, N) float32 (PyTorch Conv1d layout). Returns (B, d, d)."""
    B, _, N = x_bdn.shape
    dd = d * d
    # Channels-last so the per-point MLP is one big (rows, C) matmul per layer.
    # TODO(synk): consume x in its native (B, d, N) layout to save this HBM pass.
    x_bnd = jnp.transpose(x_bdn, (0, 2, 1))                         # (B, N, d) f32

    # Layer 1 stays f32 (VPU path); layers 2..6 use bf16 MXU operands.
    w1 = params[0][0].astype(jnp.float32)
    wbf = [w.astype(jnp.bfloat16) for (w, _) in params]
    b2d = [b.reshape(1, -1).astype(jnp.float32) for (_, b) in params]
    # Fold the flattened identity into fc3's bias (saves one input + one add).
    b6i = b2d[5] + jnp.eye(d, dtype=jnp.float32).reshape(1, dd)

    vmem_bytes, rows_target = _vmem_and_rows()
    bt, nt = _choose_tiles(B, N, rows_target)
    grid = (B // bt, N // nt)

    def const_spec(arr):
        zeros = (0,) * arr.ndim
        return pl.BlockSpec(arr.shape, lambda *_: zeros)

    consts = [w1, b2d[0], wbf[1], b2d[1], wbf[2], b2d[2],
              wbf[3], b2d[3], wbf[4], b2d[4], wbf[5], b6i]

    in_specs = [pl.BlockSpec((bt, nt, d), lambda bi, ki: (bi, ki, 0))]
    in_specs += [const_spec(a) for a in consts]

    flops = (2 * B * N * (d * 64 + 64 * 128 + 128 * 1024)
             + 2 * B * (1024 * 512 + 512 * 256 + 256 * dd))
    bytes_accessed = (int(x_bnd.size) * 4
                      + sum(int(a.size) * int(a.dtype.itemsize) for a in consts)
                      + B * dd * 4)

    out = pl.pallas_call(
        stn_kernel,
        out_shape=jax.ShapeDtypeStruct((B, 1, dd), jnp.float32),
        grid_spec=pltpu.PrefetchScalarGridSpec(
            num_scalar_prefetch=0,
            grid=grid,
            in_specs=in_specs,
            out_specs=pl.BlockSpec((bt, 1, dd), lambda bi, ki: (bi, 0, 0)),
            scratch_shapes=[pltpu.VMEM((bt, 1024), jnp.float32)],
        ),
        compiler_params=pltpu.CompilerParams(
            dimension_semantics=("parallel", "arbitrary"),
            vmem_limit_bytes=vmem_bytes),
        cost_estimate=pl.CostEstimate(flops=flops, transcendentals=0,
                                      bytes_accessed=int(bytes_accessed)),
    )(x_bnd, *consts)

    return out.reshape(B, d, d)


# --------------------------------------------------------------------------- #
# Pure-JAX (f32) reference with identical semantics
# --------------------------------------------------------------------------- #
def stn_ref(x_bdn, params, d):
    B, _, N = x_bdn.shape
    h = jnp.transpose(x_bdn, (0, 2, 1)).reshape(B * N, d)
    for w, b in params[:3]:
        h = jnp.maximum(h @ w + b, 0.0)
    g = jnp.max(h.reshape(B, N, -1), axis=1)            # (B, 1024)
    f = g
    for w, b in params[3:5]:
        f = jnp.maximum(f @ w + b, 0.0)
    w, b = params[5]
    out = f @ w + b + jnp.eye(d, dtype=jnp.float32).reshape(1, d * d)
    return out.reshape(B, d, d)


if __name__ == "__main__":
    B, d, N = 2, 4, 16
    key = jax.random.PRNGKey(0)
    k_x, k_p = jax.random.split(key)
    x = jax.random.normal(k_x, (B, d, N), jnp.float32)   # PyTorch Conv1d layout (B, d, N)
    params = init_params(k_p, d)

    y = stn_forward(x, params, d)
    y = jax.block_until_ready(y)

    y_ref = stn_ref(x, params, d)
    assert y.shape == (B, d, d)
    # Matmuls (layers 2..6) run in bf16 with f32 accumulation -> loose tolerance.
    assert jnp.allclose(y, y_ref, rtol=2e-2, atol=2e-2), "mismatch vs JAX reference"
    print("KERNEL_OK")
</pallas_src>

<mosaic_0001>
module attributes {stable_mosaic.version = 11 : i64} {
  func.func @stn_kernel(%arg0: i32, %arg1: i32, %arg2: memref<1x16x4xf32, #tpu.memory_space<vmem>>, %arg3: memref<4x64xf32, #tpu.memory_space<vmem>>, %arg4: memref<1x64xf32, #tpu.memory_space<vmem>>, %arg5: memref<64x128xbf16, #tpu.memory_space<vmem>>, %arg6: memref<1x128xf32, #tpu.memory_space<vmem>>, %arg7: memref<128x1024xbf16, #tpu.memory_space<vmem>>, %arg8: memref<1x1024xf32, #tpu.memory_space<vmem>>, %arg9: memref<1024x512xbf16, #tpu.memory_space<vmem>>, %arg10: memref<1x512xf32, #tpu.memory_space<vmem>>, %arg11: memref<512x256xbf16, #tpu.memory_space<vmem>>, %arg12: memref<1x256xf32, #tpu.memory_space<vmem>>, %arg13: memref<256x16xbf16, #tpu.memory_space<vmem>>, %arg14: memref<1x16xf32, #tpu.memory_space<vmem>>, %arg15: memref<1x1x16xf32, #tpu.memory_space<vmem>>, %arg16: memref<1x1024xf32, #tpu.memory_space<vmem>>) attributes {dimension_semantics = [#tpu.dimension_semantics<parallel>, #tpu.dimension_semantics<arbitrary>], iteration_bounds = array<i64: 2, 1>, scalar_prefetch = 0 : i64, scratch_operands = 1 : i64, tpu.core_type = #tpu.core_type<tc>, window_params = [{transform_indices = @transform_0, window_bounds = array<i64: 1, 16, 4>}, {pipeline_mode = #tpu.pipeline_mode<synchronous>, transform_indices = @transform_1, window_bounds = array<i64: 4, 64>}, {pipeline_mode = #tpu.pipeline_mode<synchronous>, transform_indices = @transform_2, window_bounds = array<i64: 1, 64>}, {pipeline_mode = #tpu.pipeline_mode<synchronous>, transform_indices = @transform_3, window_bounds = array<i64: 64, 128>}, {pipeline_mode = #tpu.pipeline_mode<synchronous>, transform_indices = @transform_4, window_bounds = array<i64: 1, 128>}, {pipeline_mode = #tpu.pipeline_mode<synchronous>, transform_indices = @transform_5, window_bounds = array<i64: 128, 1024>}, {pipeline_mode = #tpu.pipeline_mode<synchronous>, transform_indices = @transform_6, window_bounds = array<i64: 1, 1024>}, {pipeline_mode = #tpu.pipeline_mode<synchronous>, transform_indices = @transform_7, window_bounds = array<i64: 1024, 512>}, {pipeline_mode = #tpu.pipeline_mode<synchronous>, transform_indices = @transform_8, window_bounds = array<i64: 1, 512>}, {pipeline_mode = #tpu.pipeline_mode<synchronous>, transform_indices = @transform_9, window_bounds = array<i64: 512, 256>}, {pipeline_mode = #tpu.pipeline_mode<synchronous>, transform_indices = @transform_10, window_bounds = array<i64: 1, 256>}, {pipeline_mode = #tpu.pipeline_mode<synchronous>, transform_indices = @transform_11, window_bounds = array<i64: 256, 16>}, {pipeline_mode = #tpu.pipeline_mode<synchronous>, transform_indices = @transform_12, window_bounds = array<i64: 1, 16>}, {transform_indices = @transform_13, window_bounds = array<i64: 1, 1, 16>}]} {
    %c0 = arith.constant 0 : index
    %c0_0 = arith.constant 0 : index
    %c0_1 = arith.constant 0 : index
    %0 = vector.load %arg2[%c0, %c0_0, %c0_1] : memref<1x16x4xf32, #tpu.memory_space<vmem>>, vector<1x16x4xf32>
    %1 = vector.shape_cast %0 : vector<1x16x4xf32> to vector<16x4xf32>
    %c0_2 = arith.constant 0 : index
    %c0_3 = arith.constant 0 : index
    %2 = vector.load %arg3[%c0_2, %c0_3] : memref<4x64xf32, #tpu.memory_space<vmem>>, vector<4x64xf32>
    %c0_4 = arith.constant 0 : index
    %c0_5 = arith.constant 0 : index
    %3 = vector.load %arg4[%c0_4, %c0_5] : memref<1x64xf32, #tpu.memory_space<vmem>>, vector<1x64xf32>
    %4 = vector.extract_strided_slice %1 {offsets = [0, 0], sizes = [16, 1], strides = [1, 1]} : vector<16x4xf32> to vector<16x1xf32>
    %5 = vector.extract_strided_slice %2 {offsets = [0, 0], sizes = [1, 64], strides = [1, 1]} : vector<4x64xf32> to vector<1x64xf32>
    %6 = vector.broadcast %4 : vector<16x1xf32> to vector<16x64xf32>
    %7 = vector.broadcast %5 : vector<1x64xf32> to vector<16x64xf32>
    %8 = arith.mulf %6, %7 : vector<16x64xf32>
    %9 = vector.broadcast %3 : vector<1x64xf32> to vector<16x64xf32>
    %10 = arith.addf %9, %8 : vector<16x64xf32>
    %11 = vector.extract_strided_slice %1 {offsets = [0, 1], sizes = [16, 1], strides = [1, 1]} : vector<16x4xf32> to vector<16x1xf32>
    %12 = vector.extract_strided_slice %2 {offsets = [1, 0], sizes = [1, 64], strides = [1, 1]} : vector<4x64xf32> to vector<1x64xf32>
    %13 = vector.broadcast %11 : vector<16x1xf32> to vector<16x64xf32>
    %14 = vector.broadcast %12 : vector<1x64xf32> to vector<16x64xf32>
    %15 = arith.mulf %13, %14 : vector<16x64xf32>
    %16 = arith.addf %10, %15 : vector<16x64xf32>
    %17 = vector.extract_strided_slice %1 {offsets = [0, 2], sizes = [16, 1], strides = [1, 1]} : vector<16x4xf32> to vector<16x1xf32>
    %18 = vector.extract_strided_slice %2 {offsets = [2, 0], sizes = [1, 64], strides = [1, 1]} : vector<4x64xf32> to vector<1x64xf32>
    %19 = vector.broadcast %17 : vector<16x1xf32> to vector<16x64xf32>
    %20 = vector.broadcast %18 : vector<1x64xf32> to vector<16x64xf32>
    %21 = arith.mulf %19, %20 : vector<16x64xf32>
    %22 = arith.addf %16, %21 : vector<16x64xf32>
    %23 = vector.extract_strided_slice %1 {offsets = [0, 3], sizes = [16, 1], strides = [1, 1]} : vector<16x4xf32> to vector<16x1xf32>
    %24 = vector.extract_strided_slice %2 {offsets = [3, 0], sizes = [1, 64], strides = [1, 1]} : vector<4x64xf32> to vector<1x64xf32>
    %25 = vector.broadcast %23 : vector<16x1xf32> to vector<16x64xf32>
    %26 = vector.broadcast %24 : vector<1x64xf32> to vector<16x64xf32>
    %27 = arith.mulf %25, %26 : vector<16x64xf32>
    %28 = arith.addf %22, %27 : vector<16x64xf32>
    %cst = arith.constant 0.000000e+00 : f32
    %29 = vector.broadcast %cst : f32 to vector<16x64xf32>
    %30 = arith.maximumf %28, %29 : vector<16x64xf32>
    %31 = arith.truncf %30 : vector<16x64xf32> to vector<16x64xbf16>
    %c0_6 = arith.constant 0 : index
    %c0_7 = arith.constant 0 : index
    %32 = vector.load %arg5[%c0_6, %c0_7] : memref<64x128xbf16, #tpu.memory_space<vmem>>, vector<64x128xbf16>
    %cst_8 = arith.constant dense<0.000000e+00> : vector<16x128xf32>
    %33 = tpu.matmul %31, %32, %cst_8 {dimension_numbers = #tpu.dot_dimension_numbers<[1], [0], [0], [1], [0, 0, 1, 1], [], []>} : vector<16x64xbf16>, vector<64x128xbf16>, vector<16x128xf32> -> vector<16x128xf32>
    %c0_9 = arith.constant 0 : index
    %c0_10 = arith.constant 0 : index
    %34 = vector.load %arg6[%c0_9, %c0_10] : memref<1x128xf32, #tpu.memory_space<vmem>>, vector<1x128xf32>
    %35 = vector.broadcast %34 : vector<1x128xf32> to vector<16x128xf32>
    %36 = arith.addf %33, %35 : vector<16x128xf32>
    %cst_11 = arith.constant 0.000000e+00 : f32
    %37 = vector.broadcast %cst_11 : f32 to vector<16x128xf32>
    %38 = arith.maximumf %36, %37 : vector<16x128xf32>
    %39 = arith.truncf %38 : vector<16x128xf32> to vector<16x128xbf16>
    %c0_12 = arith.constant 0 : index
    %c0_13 = arith.constant 0 : index
    %40 = vector.load %arg7[%c0_12, %c0_13] : memref<128x1024xbf16, #tpu.memory_space<vmem>>, vector<128x1024xbf16>
    %cst_14 = arith.constant dense<0.000000e+00> : vector<16x1024xf32>
    %41 = tpu.matmul %39, %40, %cst_14 {dimension_numbers = #tpu.dot_dimension_numbers<[1], [0], [0], [1], [0, 0, 1, 1], [], []>} : vector<16x128xbf16>, vector<128x1024xbf16>, vector<16x1024xf32> -> vector<16x1024xf32>
    %42 = vector.shape_cast %41 : vector<16x1024xf32> to vector<1x16x1024xf32>
    %cst_15 = arith.constant dense<0xFF800000> : vector<1x1024xf32>
    %43 = vector.multi_reduction <maximumf>, %42, %cst_15 [1] : vector<1x16x1024xf32> to vector<1x1024xf32>
    %c0_i32 = arith.constant 0 : i32
    %44 = arith.cmpi eq, %arg1, %c0_i32 : i32
    %45 = arith.extui %44 : i1 to i32
    %c0_i32_16 = arith.constant 0 : i32
    %46 = arith.cmpi ne, %45, %c0_i32_16 : i32
    scf.if %46 {
      %c0_21 = arith.constant 0 : index
      %c0_22 = arith.constant 0 : index
      %53 = vector.load %arg16[%c0_21, %c0_22] : memref<1x1024xf32, #tpu.memory_space<vmem>>, vector<1x1024xf32>
      tpu.vector_store %arg16[%c0_21, %c0_22], %43 {strides = array<i32>} : memref<1x1024xf32, #tpu.memory_space<vmem>>, vector<1x1024xf32>,
    } else {
    }
    %c0_i32_17 = arith.constant 0 : i32
    %47 = arith.cmpi sgt, %arg1, %c0_i32_17 : i32
    %48 = arith.extui %47 : i1 to i32
    %c0_i32_18 = arith.constant 0 : i32
    %49 = arith.cmpi ne, %48, %c0_i32_18 : i32
    scf.if %49 {
      %c0_21 = arith.constant 0 : index
      %c0_22 = arith.constant 0 : index
      %53 = vector.load %arg16[%c0_21, %c0_22] : memref<1x1024xf32, #tpu.memory_space<vmem>>, vector<1x1024xf32>
      %54 = arith.maximumf %53, %43 : vector<1x1024xf32>
      %c0_23 = arith.constant 0 : index
      %c0_24 = arith.constant 0 : index
      %55 = vector.load %arg16[%c0_23, %c0_24] : memref<1x1024xf32, #tpu.memory_space<vmem>>, vector<1x1024xf32>
      tpu.vector_store %arg16[%c0_23, %c0_24], %54 {strides = array<i32>} : memref<1x1024xf32, #tpu.memory_space<vmem>>, vector<1x1024xf32>,
    } else {
    }
    %c0_i32_19 = arith.constant 0 : i32
    %50 = arith.cmpi eq, %arg1, %c0_i32_19 : i32
    %51 = arith.extui %50 : i1 to i32
    %c0_i32_20 = arith.constant 0 : i32
    %52 = arith.cmpi ne, %51, %c0_i32_20 : i32
    scf.if %52 {
      %c0_21 = arith.constant 0 : index
      %c0_22 = arith.constant 0 : index
      %53 = vector.load %arg16[%c0_21, %c0_22] : memref<1x1024xf32, #tpu.memory_space<vmem>>, vector<1x1024xf32>
      %c0_23 = arith.constant 0 : index
      %c0_24 = arith.constant 0 : index
      %54 = vector.load %arg8[%c0_23, %c0_24] : memref<1x1024xf32, #tpu.memory_space<vmem>>, vector<1x1024xf32>
      %55 = arith.addf %53, %54 : vector<1x1024xf32>
      %cst_25 = arith.constant 0.000000e+00 : f32
      %56 = vector.broadcast %cst_25 : f32 to vector<1x1024xf32>
      %57 = arith.maximumf %55, %56 : vector<1x1024xf32>
      %58 = arith.truncf %57 : vector<1x1024xf32> to vector<1x1024xbf16>
      %c0_26 = arith.constant 0 : index
      %c0_27 = arith.constant 0 : index
      %59 = vector.load %arg9[%c0_26, %c0_27] : memref<1024x512xbf16, #tpu.memory_space<vmem>>, vector<1024x512xbf16>
      %cst_28 = arith.constant dense<0.000000e+00> : vector<1x512xf32>
      %60 = tpu.matmul %58, %59, %cst_28 {dimension_numbers = #tpu.dot_dimension_numbers<[1], [0], [0], [1], [0, 0, 1, 1], [], []>} : vector<1x1024xbf16>, vector<1024x512xbf16>, vector<1x512xf32> -> vector<1x512xf32>
      %c0_29 = arith.constant 0 : index
      %c0_30 = arith.constant 0 : index
      %61 = vector.load %arg10[%c0_29, %c0_30] : memref<1x512xf32, #tpu.memory_space<vmem>>, vector<1x512xf32>
      %62 = arith.addf %60, %61 : vector<1x512xf32>
      %cst_31 = arith.constant 0.000000e+00 : f32
      %63 = vector.broadcast %cst_31 : f32 to vector<1x512xf32>
      %64 = arith.maximumf %62, %63 : vector<1x512xf32>
      %65 = arith.truncf %64 : vector<1x512xf32> to vector<1x512xbf16>
      %c0_32 = arith.constant 0 : index
      %c0_33 = arith.constant 0 : index
      %66 = vector.load %arg11[%c0_32, %c0_33] : memref<512x256xbf16, #tpu.memory_space<vmem>>, vector<512x256xbf16>
      %cst_34 = arith.constant dense<0.000000e+00> : vector<1x256xf32>
      %67 = tpu.matmul %65, %66, %cst_34 {dimension_numbers = #tpu.dot_dimension_numbers<[1], [0], [0], [1], [0, 0, 1, 1], [], []>} : vector<1x512xbf16>, vector<512x256xbf16>, vector<1x256xf32> -> vector<1x256xf32>
      %c0_35 = arith.constant 0 : index
      %c0_36 = arith.constant 0 : index
      %68 = vector.load %arg12[%c0_35, %c0_36] : memref<1x256xf32, #tpu.memory_space<vmem>>, vector<1x256xf32>
      %69 = arith.addf %67, %68 : vector<1x256xf32>
      %cst_37 = arith.constant 0.000000e+00 : f32
      %70 = vector.broadcast %cst_37 : f32 to vector<1x256xf32>
      %71 = arith.maximumf %69, %70 : vector<1x256xf32>
      %72 = arith.truncf %71 : vector<1x256xf32> to vector<1x256xbf16>
      %c0_38 = arith.constant 0 : index
      %c0_39 = arith.constant 0 : index
      %73 = vector.load %arg13[%c0_38, %c0_39] : memref<256x16xbf16, #tpu.memory_space<vmem>>, vector<256x16xbf16>
      %cst_40 = arith.constant dense<0.000000e+00> : vector<1x16xf32>
      %74 = tpu.matmul %72, %73, %cst_40 {dimension_numbers = #tpu.dot_dimension_numbers<[1], [0], [0], [1], [0, 0, 1, 1], [], []>} : vector<1x256xbf16>, vector<256x16xbf16>, vector<1x16xf32> -> vector<1x16xf32>
      %c0_41 = arith.constant 0 : index
      %c0_42 = arith.constant 0 : index
      %75 = vector.load %arg14[%c0_41, %c0_42] : memref<1x16xf32, #tpu.memory_space<vmem>>, vector<1x16xf32>
      %76 = arith.addf %74, %75 : vector<1x16xf32>
      %77 = vector.shape_cast %76 : vector<1x16xf32> to vector<1x1x16xf32>
      %c0_43 = arith.constant 0 : index
      %c0_44 = arith.constant 0 : index
      %c0_45 = arith.constant 0 : index
      %78 = vector.load %arg15[%c0_43, %c0_44, %c0_45] : memref<1x1x16xf32, #tpu.memory_space<vmem>>, vector<1x1x16xf32>
      tpu.vector_store %arg15[%c0_43, %c0_44, %c0_45], %77 {strides = array<i32>} : memref<1x1x16xf32, #tpu.memory_space<vmem>>, vector<1x1x16xf32>,
    } else {
    }
    return
  }
  func.func @transform_0(%arg0: i32, %arg1: i32) -> (i32, i32, i32) {
    %c0_i32 = arith.constant 0 : i32
    %c0_i32_0 = arith.constant 0 : i32
    return %arg0, %arg1, %c0_i32 : i32, i32, i32
  }
  func.func @transform_1(%arg0: i32, %arg1: i32) -> (i32, i32) {
    %c0_i32 = arith.constant 0 : i32
    %c0_i32_0 = arith.constant 0 : i32
    %c0_i32_1 = arith.constant 0 : i32
    return %c0_i32, %c0_i32_0 : i32, i32
  }
  func.func @transform_2(%arg0: i32, %arg1: i32) -> (i32, i32) {
    %c0_i32 = arith.constant 0 : i32
    %c0_i32_0 = arith.constant 0 : i32
    %c0_i32_1 = arith.constant 0 : i32
    return %c0_i32, %c0_i32_0 : i32, i32
  }
  func.func @transform_3(%arg0: i32, %arg1: i32) -> (i32, i32) {
    %c0_i32 = arith.constant 0 : i32
    %c0_i32_0 = arith.constant 0 : i32
    %c0_i32_1 = arith.constant 0 : i32
    return %c0_i32, %c0_i32_0 : i32, i32
  }
  func.func @transform_4(%arg0: i32, %arg1: i32) -> (i32, i32) {
    %c0_i32 = arith.constant 0 : i32
    %c0_i32_0 = arith.constant 0 : i32
    %c0_i32_1 = arith.constant 0 : i32
    return %c0_i32, %c0_i32_0 : i32, i32
  }
  func.func @transform_5(%arg0: i32, %arg1: i32) -> (i32, i32) {
    %c0_i32 = arith.constant 0 : i32
    %c0_i32_0 = arith.constant 0 : i32
    %c0_i32_1 = arith.constant 0 : i32
    return %c0_i32, %c0_i32_0 : i32, i32
  }
  func.func @transform_6(%arg0: i32, %arg1: i32) -> (i32, i32) {
    %c0_i32 = arith.constant 0 : i32
    %c0_i32_0 = arith.constant 0 : i32
    %c0_i32_1 = arith.constant 0 : i32
    return %c0_i32, %c0_i32_0 : i32, i32
  }
  func.func @transform_7(%arg0: i32, %arg1: i32) -> (i32, i32) {
    %c0_i32 = arith.constant 0 : i32
    %c0_i32_0 = arith.constant 0 : i32
    %c0_i32_1 = arith.constant 0 : i32
    return %c0_i32, %c0_i32_0 : i32, i32
  }
  func.func @transform_8(%arg0: i32, %arg1: i32) -> (i32, i32) {
    %c0_i32 = arith.constant 0 : i32
    %c0_i32_0 = arith.constant 0 : i32
    %c0_i32_1 = arith.constant 0 : i32
    return %c0_i32, %c0_i32_0 : i32, i32
  }
  func.func @transform_9(%arg0: i32, %arg1: i32) -> (i32, i32) {
    %c0_i32 = arith.constant 0 : i32
    %c0_i32_0 = arith.constant 0 : i32
    %c0_i32_1 = arith.constant 0 : i32
    return %c0_i32, %c0_i32_0 : i32, i32
  }
  func.func @transform_10(%arg0: i32, %arg1: i32) -> (i32, i32) {
    %c0_i32 = arith.constant 0 : i32
    %c0_i32_0 = arith.constant 0 : i32
    %c0_i32_1 = arith.constant 0 : i32
    return %c0_i32, %c0_i32_0 : i32, i32
  }
  func.func @transform_11(%arg0: i32, %arg1: i32) -> (i32, i32) {
    %c0_i32 = arith.constant 0 : i32
    %c0_i32_0 = arith.constant 0 : i32
    %c0_i32_1 = arith.constant 0 : i32
    return %c0_i32, %c0_i32_0 : i32, i32
  }
  func.func @transform_12(%arg0: i32, %arg1: i32) -> (i32, i32) {
    %c0_i32 = arith.constant 0 : i32
    %c0_i32_0 = arith.constant 0 : i32
    %c0_i32_1 = arith.constant 0 : i32
    return %c0_i32, %c0_i32_0 : i32, i32
  }
  func.func @transform_13(%arg0: i32, %arg1: i32) -> (i32, i32, i32) {
    %c0_i32 = arith.constant 0 : i32
    %c0_i32_0 = arith.constant 0 : i32
    %c0_i32_1 = arith.constant 0 : i32
    return %arg0, %c0_i32, %c0_i32_0 : i32, i32, i32
  }
}

</mosaic_0001>

<bundles_post_ra>
// kernel: tpu_custom_call.1
= control target key start
LH: loop header
LB: loop body
LE: loop exit
PB: predicated region body
PF: predicated region fallthrough
CT: control target
= control target key end

     0   :  { %s5847_s0 = inlined_call_operand.vmem [shape: f32[2,16,4], index: 0, kind: input, shape index: {}]   ;;  %s5848_s1 = inlined_call_operand.vmem [shape: f32[4,64], index: 1, kind: input, shape index: {}]   ;;  %s5849_s2 = inlined_call_operand.vmem [shape: f32[1,64], index: 2, kind: input, shape index: {}]   ;;  %s5850_s3 = inlined_call_operand.vmem [shape: bf16[64,128], index: 3, kind: input, shape index: {}]   ;;  %s5851_s4 = inlined_call_operand.vmem [shape: f32[1,128], index: 4, kind: input, shape index: {}]   ;;  %s5852_s5 = inlined_call_operand.hbm [shape: bf16[128,1024], index: 5, kind: input, shape index: {}]   ;;  %s5853_s6 = inlined_call_operand.vmem [shape: f32[1,1024], index: 6, kind: input, shape index: {}]   ;;  %s5854_s7 = inlined_call_operand.hbm [shape: bf16[1024,512], index: 7, kind: input, shape index: {}]   ;;  %s5855_s8 = inlined_call_operand.vmem [shape: f32[1,512], index: 8, kind: input, shape index: {}]   ;;  %s5856_s9 = inlined_call_operand.hbm [shape: bf16[512,256], index: 9, kind: input, shape index: {}]   ;;  %s5857_s10 = inlined_call_operand.vmem [shape: f32[1,256], index: 10, kind: input, shape index: {}]   ;;  %s5858_s11 = inlined_call_operand.vmem [shape: bf16[256,16], index: 11, kind: input, shape index: {}]   ;;  %s5859_s12 = inlined_call_operand.vmem [shape: f32[1,16], index: 12, kind: input, shape index: {}]   ;;  %s5860_s13 = inlined_call_operand.hbm [shape: f32[2,1,16], index: 13, kind: output, shape index: {}]  }
   0x1   :  { %5875 = sst [smem:[#allocation21_spill]] %s5854_s7 }
   0x2   :  { %5876 = sst [smem:[#allocation22_spill]] %s5859_s12 }
   0x3   :  { %5877 = sst [smem:[#allocation23_spill]] %s5860_s13 }
   0x4   :  { %18 = vsyncpa [#allocation4], 0 }
   0x5   :  { %19 = vsyncpa [#allocation7], 0 }
   0x6   :  { %20 = vsyncpa [#allocation5], 0 }
   0x7   :  { %22 = vsyncpa [#allocation5 + $0x1], 0  ;;  %s5494_s25 = smov 0   ;;  %s5496_s26 = smov 0  }
   0x8   :  { %s5498_s27 = smov 0   ;;  %s5500_s28 = smov 0  }
   0x9   :  { %s5502_s29 = smov 0   ;;  %s5504_s30 = smov 0  }
   0xa LB: > { %5878 = sst [smem:[#allocation13_spill]] %s5385_s25  ;;  %s4133_s14 = sadd.s32 4294967295, %s5405_s30   ;;  %s5405_s30 = sphi %s5504_s30, %s28_s30   ;;  %s5401_s29 = sphi %s5502_s29, %s5906_s29   ;;  %s5397_s28 = sphi %s5500_s28, %s5905_s28   ;;  %s5393_s27 = sphi %s5498_s27, %s5904_s27   ;;  %s5389_s26 = sphi %s5496_s26, %s5908_s26   ;;  %s5385_s25 = sphi %s5494_s25, %s5907_s25  }
   0xb   : > { %5879 = sst [smem:[#allocation14_spill]] %s5393_s27  ;;  %s4134_s15 = sadd.s32 4294967294, %s5405_s30  }
   0xc   : > { %5880 = sst [smem:[#allocation15_spill]] %s5401_s29  ;;  %s40_s16 = sadd.s32 1, %s5401_s29 }
   0xd   : > { %5881 = sst [smem:[#allocation16_spill]] %s5405_s30  ;;  %s327_s17 = sadd.s32 1, %s5393_s27 }
   0xe   : > { %p42_p0 = scmp.ge.s32.totalorder %s40_s16, 2  ;;  %p337_p1 = scmp.ne.s32.totalorder %s5393_s27, %s5389_s26 }
   0xf   : > { %p338_p2 = scmp.eq.s32.totalorder %s4133_s14, 1  ;;  %p343_p3 = scmp.ne.s32.totalorder %s5389_s26, %s5385_s25 }
  0x10   : > { %s5910_s16 = smov (%p42_p0, %s40_s16), 0  ;;  %p344_p5 = scmp.eq.s32.totalorder %s4134_s15, 1 }
  0x11   : > { %5882 = sst [smem:[#allocation17_spill]] %s5910_s16  ;;  %p5534_p4 = por %p338_p2, %p337_p1 }
  0x12   : > { %s324_s19 = ssub.s32 %s5401_s29, %s5910_s16  ;;  %p4135_p6 = scmp.ge.s32.totalorder %s5405_s30, 1 }
  0x13   : > { %s5883_s18 = scalar_select %p5534_p4, 1, 0 }
  0x14   : > { %p325_p7 = scmp.eq.s32.totalorder %s324_s19, 0  ;;  %p5541_p8 = por %p344_p5, %p343_p3 }
  0x15   : > { %5884 = sst [smem:[#allocation18_spill]] %s5883_s18  ;;  %p351_p9 = scmp.lt.s32.totalorder %s5405_s30, 3 }
  0x16   : > { %s5885_s20 = scalar_select %p5541_p8, 1, 0 }
  0x17   : > { %s5547_s21 = scalar_select %p325_p7, %s5393_s27, %s327_s17  }
  0x18   : > { %5886 = sst [smem:[#allocation19_spill]] %s5885_s20  ;;  %p5549_p10 = pnand %p4135_p6, %p351_p9 }
  0x19   : > { %5887 = sst [smem:[#allocation20_spill]] %s5547_s21  ;;  %p5553_p11 = scmp.eq.s32.totalorder %s4133_s14, 0 }
  0x1a   : > { %s5888_s22 = scalar_select %p5549_p10, 1, 0 }
  0x1b   : > { %s5889_s23 = scalar_select %p5553_p11, 1, 0 }
  0x1c   : > { %p4644_p12 = pneg %p5549_p10  ;;  %s5407_s24 = smov [#allocation6]  }
  0x1d   : > { %s391_s15 = sshll.u32 %s5407_s24, 4  ;;  %s5408_s17 = smov [#allocation3]   ;;  %s392_s15 = int_to_ptr.vmem [resolvable:$true] %s391_s15 }
  0x1e   : > { %p5561_p13 = pnand %p5553_p11, %p4644_p12  ;;  %s375_s16 = sshll.u32 %s5408_s17, 4  ;;  %s376_s16 = int_to_ptr.vmem [resolvable:$true] %s375_s16 }
  0x1f   : > { %s5891_s7 = sld [smem:[#allocation21_spill]] }
  0x20   : > { %p5573_p1 = pneg %p5561_p13 }
  0x25   : > { %s5235_s14 = scalar_lea.hbm %s5891_s7, 32768 }
  0x26   : > { %p5236_p0 = scmp.ne.s32.totalorder %s5891_s7, %s5235_s14  ;;  %p5242_p5 = scmp.lt.u32.totalorder %s5235_s14, %s5891_s7 }
  0x28   : > { %p5238_p2 = pnand %p5573_p1, %p5236_p0 }
  0x2a   : > { %p5239_p3 = pneg %p5238_p2 }
  0x2c   : > { %p5244_p6 = pnand %p5242_p5, %p5239_p3 }
  0x2e   : > { %5247 = shalt.err (!%p5244_p6)
}
  0x2f   : > { %s5248_s29 = scalar_lea.vmem %s392_s15, 32768  ;;  %p5256_p8 = scmp.lt.s32.totalorder %s392_s15, %s392_s15 }
  0x30   : > { %p5249_p7 = scmp.ne.s32.totalorder %s392_s15, %s5248_s29  ;;  %p5257_p4 = scmp.lt.s32.totalorder %s5248_s29, %s5248_s29 }
  0x32   : > { %p5251_p9 = pnand %p5249_p7, %p5573_p1  ;;  %p5258_p11 = por %p5257_p4, %p5256_p8 }
  0x34   : > { %p5252_p12 = pneg %p5251_p9 }
  0x36   : > { %p5259_p10 = pnand %p5258_p11, %p5252_p12 }
  0x38   : > { %5262 = shalt.err (!%p5259_p10)
}
  0x39   : > { %s5409_s27 = smov 256   ;;  %s5410_s20 = smov 16  }
  0x3a   : > { %4650 = dma.hbm_to_vmem [thread:$0]  (!%p5561_p13), %s5891_s7, 32768, %s392_s15, [#allocation7], %s5409_s27, %s5409_s27, %s5410_s20  }
  0x3b   : > { %s5263_s14 = scalar_lea.hbm %s5852_s5, 8192 }
  0x3c   : > { %p5264_p4 = scmp.ne.s32.totalorder %s5852_s5, %s5263_s14  ;;  %p5270_p11 = scmp.lt.u32.totalorder %s5263_s14, %s5852_s5 }
  0x3e   : > { %p5266_p8 = pnand %p5264_p4, %p5573_p1 }
  0x40   : > { %p5267_p10 = pneg %p5266_p8 }
  0x42   : > { %p5272_p0 = pnand %p5270_p11, %p5267_p10 }
  0x44   : > { %5275 = shalt.err (!%p5272_p0)
}
  0x45   : > { %s5276_s25 = scalar_lea.vmem %s376_s16, 8192  ;;  %p5284_p6 = scmp.lt.s32.totalorder %s376_s16, %s376_s16 }
  0x46   : > { %p5277_p2 = scmp.ne.s32.totalorder %s376_s16, %s5276_s25  ;;  %p5285_p7 = scmp.lt.s32.totalorder %s5276_s25, %s5276_s25 }
  0x48   : > { %p5279_p3 = pnand %p5277_p2, %p5573_p1  ;;  %p5286_p9 = por %p5285_p7, %p5284_p6 }
  0x4a   : > { %p5280_p5 = pneg %p5279_p3 }
  0x4c   : > { %p5287_p12 = pnand %p5286_p9, %p5280_p5 }
  0x4e   : > { %5290 = shalt.err (!%p5287_p12)
}
  0x4f   : > { %s5411_s13 = smov 512   ;;  %s5412_s18 = smov 32  }
  0x50   : > { %4647 = dma.hbm_to_vmem [thread:$0]  (!%p5561_p13), %s5852_s5, 8192, %s376_s16, [#allocation4], %s5411_s13, %s5411_s13, %s5412_s18  }
  0x51   : > { %s5413_s27 = smov [#allocation8]   ;;  %s5291_s17 = scalar_lea.hbm %s5856_s9, 8192 }
  0x52   : > { %s407_s20 = sshll.u32 %s5413_s27, 4  ;;  %p5292_p4 = scmp.ne.s32.totalorder %s5856_s9, %s5291_s17  ;;  %s408_s20 = int_to_ptr.vmem [resolvable:$true] %s407_s20 }
  0x53   : > { %p5298_p11 = scmp.lt.u32.totalorder %s5291_s17, %s5856_s9 }
  0x54   : > { %p5294_p8 = pnand %p5292_p4, %p5573_p1 }
  0x56   : > { %p5295_p10 = pneg %p5294_p8 }
  0x58   : > { %p5300_p0 = pnand %p5298_p11, %p5295_p10 }
  0x5a   : > { %5303 = shalt.err (!%p5300_p0)
}
  0x5b   : > { %s5304_s16 = scalar_lea.vmem %s408_s20, 8192  ;;  %p5312_p6 = scmp.lt.s32.totalorder %s408_s20, %s408_s20 }
  0x5c   : > { %p5305_p2 = scmp.ne.s32.totalorder %s408_s20, %s5304_s16  ;;  %p5313_p7 = scmp.lt.s32.totalorder %s5304_s16, %s5304_s16 }
  0x5e   : > { %p5307_p3 = pnand %p5305_p2, %p5573_p1  ;;  %p5314_p9 = por %p5313_p7, %p5312_p6 }
  0x60   : > { %p5308_p5 = pneg %p5307_p3 }
  0x62   : > { %p5315_p12 = pnand %p5314_p9, %p5308_p5 }
  0x64   : > { %5318 = shalt.err (!%p5315_p12)
}
  0x65   : > { %s5414_s13 = smov 128   ;;  %s5415_s18 = smov 8  }
  0x66   : > { %4653 = dma.hbm_to_vmem [thread:$0]  (!%p5561_p13), %s5856_s9, 8192, %s408_s20, [#allocation7], %s5414_s13, %s5414_s13, %s5415_s18  }
  0x67   : > { %p5893_p4 = scmp.ne.s32.totalorder %s5888_s22, 0 }
  0x68   : > { %p5894_p8 = scmp.ne.s32.totalorder (!%p5893_p4), %s5889_s23, 0 }
  0x69   : > { %445 = sbr.rel (%p5893_p4) target bundleno = 1731 (0x6c3), region = 72 }
  0x70   : > { %5372 = dma.done.wait (%p5894_p8), [#allocation4], 8192  }
  0x71   : > { %5374 = vsyncadd (%p5894_p8), [#allocation4], 4294959104 }
  0x72   : > { %5376 = dma.done.wait (%p5894_p8), [#allocation7], 40960  }
  0x73   : > { %5378 = vsyncadd (%p5894_p8), [#allocation7], 4294926336  ;;  %p501_p1 = scmp.lt.s32.totalorder %s5397_s28, 1  ;;  %v5416_v0 = vmov 1   ;;  %v5417_v1 = vmov 0   ;;  %v4735_v4 = vld [vmem:[%s5850_s3] sm:$0xff]   ;;  %v525_v39 = vlaneseq }
  0x74   : > { %4730 = vset.pattern.permute.xlu1 %v5416_v0  ;;  %4729 = vset.pattern.permute.xlu0 %v5417_v1  ;;  %v5418_v5 = vmov 0.0   ;;  %v5419_v6 = vmov 2   ;;  %v4736_v7 = vld [vmem:[%s5850_s3 + $0x8] sm:$0xff]   ;;  %v5420_v8 = vmov 3   ;;  %v4737_v9 = vld [vmem:[%s5850_s3 + $0x10] sm:$0xff]   ;;  %v4738_v10 = vld [vmem:[%s5850_s3 + $0x18] sm:$0xff]  }
  0x75   : > { %s502_s22 = scalar_select %p501_p1, %s5397_s28, 1  ;;  %1179 = vmatprep.mubr.bf16.mxu1 %v5417_v1  ;;  %4584 = vmatprep.subr.bf16.mxu0 %v5418_v5  ;;  %vm5421_vm0 = vmmov 0   ;;  %v5654_v11 = vld [vmem:[#allocation3] sm:$0xff]  ;;  %v679_v15 = vld [vmem:[#allocation3 + $0x10] sm:$0xff]  ;;  %v5662_v40 = vshrl.u32 %v525_v39, 7  ;;  %vm629_vm1 = vcmask 523264  }
  0x76   : > { %4585 = vmatpush3.bf16.msra.mxu0 %v4735_v4  ;;  %4592 = vmatprep.mubr.msk.bf16.mxu0 %vm5421_vm0, %v5418_v5  ;;  %v5656_v12 = vld [vmem:[#allocation3 + $0x20] sm:$0xff]  ;;  %v683_v16 = vld [vmem:[#allocation3 + $0x30] sm:$0xff]  ;;  %s498_s15 = sand.u32 1, %s5389_s26   ;;  %s5895_s20 = sld [smem:[#allocation22_spill]]  ;;  %vm4018_vm2 = vcmask 122880  }
  0x77   : > { %s4556_s19 = sshll.u32 %s502_s22, 4  ;;  %4586 = vmatprep.subr.bf16.mxu0 %v5418_v5  ;;  %v4153_v13 = vcombine.low %v5654_v11, %v5656_v12  ;;  %v4154_v14 = vcombine.high %v5654_v11, %v5656_v12  ;;  %v4158_v17 = vcombine.high %v679_v15, %v683_v16  ;;  %v4157_v18 = vcombine.low %v679_v15, %v683_v16  ;;  %v687_v19 = vld [vmem:[#allocation3 + $0x50] sm:$0xff]  ;;  %v513_v42 = vld [vmem:[%s5848_s1] sm:$0xf]  ;;  %s5896_s30 = sld [smem:[#allocation18_spill]] }
  0x78   : > { %s508_s27 = scalar_lea.vmem %s5847_s0, %s4556_s19  ;;  %v691_v20 = vld [vmem:[#allocation3 + $0x70] sm:$0xff]  ;;  %v5665_v41 = vsub.s32 0, %v5662_v40  ;;  %v5672_v46 = vsub.s32 1, %v5662_v40  ;;  %v5675_v47 = vsub.s32 2, %v5662_v40  ;;  %v4146_v52 = vld [vmem:[%s5849_s2] ss:$0 sm:$0xff] }
  0x79   : > { %v511_v2 = vld [vmem:[%s508_s27] sm:$0xff]  ;;  %v512_v3 = vld [vmem:[%s508_s27 + $0x8] sm:$0xff]  ;;  %1147 = vmatprep.subr.bf16.mxu1 %v4158_v17  ;;  %v4166_v21 = vcombine.high %v687_v19, %v691_v20  ;;  %v4165_v22 = vcombine.low %v687_v19, %v691_v20  ;;  %v695_v23 = vld [vmem:[#allocation3 + $0x90] sm:$0xff]  ;;  %v5681_v53 = vsub.s32 3, %v5662_v40  ;;  %s4553_s21 = sshll.u32 %s5397_s28, 4  ;;  %s499_s17 = scalar_lea.vmem [#allocation9], %s498_s15 }
  0x7a   : > { %540 = vperm.xlu1 %4730, %v511_v2   ;;  %517 = vperm.xlu0 %4729, %v511_v2   ;;  %v699_v24 = vld [vmem:[#allocation3 + $0xb0] sm:$0xff]  ;;  %v528_v45 = vrot.slane %v513_v42, %v5665_v41  ;;  %v550_v54 = vrot.slane %v513_v42, %v5672_v46  ;;  %v566_v56 = vrot.slane %v513_v42, %v5675_v47  ;;  %v685_v15 = vld [vmem:[#allocation3 + $0x40] sm:$0xff]  ;;  %s4033_s14 = sshll.u32 %s499_s17, 4  ;;  %s5897_s16 = sld [smem:[#allocation23_spill]]  ;;  %s5802_s14 = int_to_ptr.vmem [resolvable:$true] %s4033_s14 }
  0x7b   : > { %4587 = vmatpush3.bf16.msra.mxu0 %v4736_v7  ;;  %1148 = vmatpush1.bf16.msra.mxu1 %v4157_v18  ;;  %v4174_v25 = vcombine.high %v695_v23, %v699_v24  ;;  %v4173_v26 = vcombine.low %v695_v23, %v699_v24  ;;  %v703_v27 = vld [vmem:[#allocation3 + $0xd0] sm:$0xff]  ;;  %v582_v61 = vrot.slane %v513_v42, %v5681_v53  ;;  %v689_v16 = vld [vmem:[#allocation3 + $0x60] sm:$0xff]  ;;  %s4021_s18 = scalar_lea.sflag [#allocation5], %s498_s15  ;;  %s5319_s28 = scalar_lea.vmem %s5802_s14, 16 }
  0x7c   : > { %4588 = vmatprep.subr.bf16.mxu0 %v5418_v5  ;;  %1149 = vmatprep.subr.bf16.mxu1 %v4166_v21  ;;  %v707_v28 = vld [vmem:[#allocation3 + $0xf0] sm:$0xff]  ;;  %v4162_v20 = vcombine.high %v685_v15, %v689_v16  ;;  %v693_v21 = vld [vmem:[#allocation3 + $0x80] sm:$0xff]  ;;  %v4161_v23 = vcombine.low %v685_v15, %v689_v16  ;;  %p5320_p13 = scmp.ne.s32.totalorder %s5802_s14, %s5319_s28  ;;  %s5423_s12 = smov [#allocation9]  }
  0x7d   : > { %v4182_v29 = vcombine.high %v703_v27, %v707_v28  ;;  %v4181_v30 = vcombine.low %v703_v27, %v707_v28  ;;  %v711_v31 = vld [vmem:[#allocation3 + $0x110] sm:$0xff]  ;;  %v721_v11 = vld [vmem:[#allocation3 + $0x160] sm:$0xff]  ;;  %p5898_p10 = scmp.ne.s32.totalorder %s5896_s30, 0  ;;  %s5323_s7 = sshll.u32 %s5423_s12, 4  ;;  %s5324_s7 = int_to_ptr.vmem [resolvable:$false] %s5323_s7 }
  0x7e   : > { %544 = vperm.xlu1 %4730, %v512_v3   ;;  %522 = vperm.xlu0 %4729, %v512_v3   ;;  %v715_v32 = vld [vmem:[#allocation3 + $0x130] sm:$0xff]  ;;  %s5325_s22 = scalar_lea.vmem %s5324_s7, 32  ;;  %p5326_p2 = scmp.lt.s32.totalorder %s5802_s14, %s5324_s7 }
  0x7f   : > { %4589 = vmatpush3.bf16.msra.mxu0 %v4737_v9  ;;  %1150 = vmatpush1.bf16.msra.mxu1 %v4165_v22  ;;  %v4190_v33 = vcombine.high %v711_v31, %v715_v32  ;;  %v4189_v34 = vcombine.low %v711_v31, %v715_v32  ;;  %v719_v35 = vld [vmem:[#allocation3 + $0x150] sm:$0xff]  ;;  %v697_v22 = vld [vmem:[#allocation3 + $0xa0] sm:$0xff]  ;;  %p5321_p11 = pnand %p5320_p13, %p5898_p10  ;;  %p5327_p3 = scmp.lt.s32.totalorder %s5325_s22, %s5319_s28 }
  0x80   : > { %4590 = vmatprep.subr.bf16.mxu0 %v5418_v5  ;;  %1151 = vmatprep.subr.bf16.mxu1 %v4174_v25  ;;  %v723_v36 = vld [vmem:[#allocation3 + $0x170] sm:$0xff]  ;;  %v4170_v24 = vcombine.high %v693_v21, %v697_v22  ;;  %v701_v25 = vld [vmem:[#allocation3 + $0xc0] sm:$0xff]  ;;  %v4169_v27 = vcombine.low %v693_v21, %v697_v22  ;;  %v710_v21 = vld [vmem:[#allocation3 + $0x108] sm:$0xff]  ;;  %s5800_s13 = scalar_lea.hbm %s5897_s16, %s4553_s21 }
  0x81   : > { %v4198_v37 = vcombine.high %v719_v35, %v723_v36  ;;  %v4197_v38 = vcombine.low %v719_v35, %v723_v36  ;;  %v725_v35 = vld [vmem:[#allocation3 + $0x180] sm:$0xff]  ;;  %v731_v39 = vld [vmem:[#allocation3 + $0x1b0] sm:$0xff]  ;;  %v714_v22 = vld [vmem:[#allocation3 + $0x128] sm:$0xff]  ;;  %p5322_p0 = pneg %p5321_p11  ;;  %p5328_p5 = por %p5327_p3, %p5326_p2 }
  0x82   : > { %4732 = vset.pattern.permute.xlu1 %v5419_v6  ;;  %4731 = vset.pattern.permute.xlu0 %v5419_v6  ;;  %v729_v36 = vld [vmem:[#allocation3 + $0x1a0] sm:$0xff] }
  0x83   : > { %560 = vperm.xlu1 %4732, %v512_v3   ;;  %556 = vperm.xlu0 %4731, %v511_v2   ;;  %v4201_v42 = vcombine.low %v725_v35, %v729_v36  ;;  %p5329_p6 = pnand %p5328_p5, %p5322_p0 }
  0x84   : > { %4591 = vmatpush3.bf16.msra.mxu0 %v4738_v10  ;;  %1152 = vmatpush1.bf16.msra.mxu1 %v4173_v26  ;;  %v705_v26 = vld [vmem:[#allocation3 + $0xe0] sm:$0xff] }
  0x85   : > { %1061 = vmatprep.subr.bf16.mxu0 %v4154_v14  ;;  %1153 = vmatprep.subr.bf16.mxu1 %v4182_v29  ;;  %v4178_v28 = vcombine.high %v701_v25, %v705_v26  ;;  %v709_v29 = vld [vmem:[#allocation3 + $0x100] sm:$0xff]  ;;  %v4177_v31 = vcombine.low %v701_v25, %v705_v26  ;;  %v718_v25 = vld [vmem:[#allocation3 + $0x148] sm:$0xff] }
  0x86   : > { %v722_v26 = vld [vmem:[#allocation3 + $0x168] sm:$0xff] }
  0x87   : > { %4733 = vset.pattern.permute.xlu1 %v5420_v8  ;;  %4734 = vset.pattern.permute.xlu0 %v5420_v8 }
  0x88   : > { %572 = vperm.xlu1 %4733, %v511_v2   ;;  %576 = vperm.xlu0 %4734, %v512_v3  }
  0x89   : > { %1154 = vmatpush1.bf16.msra.mxu1 %v4181_v30  ;;  %v713_v30 = vld [vmem:[#allocation3 + $0x120] sm:$0xff] }
  0x8a   : > { %1155 = vmatprep.subr.bf16.mxu1 %v4190_v33  ;;  %v4186_v32 = vcombine.high %v709_v29, %v713_v30  ;;  %v717_v33 = vld [vmem:[#allocation3 + $0x140] sm:$0xff]  ;;  %v4185_v12 = vcombine.low %v709_v29, %v713_v30  ;;  %v726_v29 = vld [vmem:[#allocation3 + $0x188] sm:$0xff] }
  0x8b   : > { %v730_v30 = vld [vmem:[#allocation3 + $0x1a8] sm:$0xff] }
  0x8d   : > { %1156 = vmatpush1.bf16.msra.mxu1 %v4189_v34  ;;  %v4193_v34 = vcombine.low %v717_v33, %v721_v11 }
  0x8e   : > { %1157 = vmatprep.subr.bf16.mxu1 %v4198_v37  ;;  %v4202_v37 = vcombine.high %v725_v35, %v729_v36  ;;  %v684_v35 = vld [vmem:[#allocation3 + $0x38] sm:$0xff] }
  0x91   : > { %1158 = vmatpush1.bf16.msra.mxu1 %v4197_v38  ;;  %v727_v38 = vld [vmem:[#allocation3 + $0x190] sm:$0xff] }
  0xf9   : > { %v541_v43 = vpop.permute.xlu1 %540  ;;  %v518_v44 = vpop.permute.xlu0 %517 }
  0xfa   : > { %v529_v50 = vmul.f32 %v528_v45, %v518_v44  ;;  %v551_v62 = vmul.f32 %v550_v54, %v541_v43  ;;  %v4206_v43 = vcombine.high %v727_v38, %v731_v39  ;;  %v4205_v44 = vcombine.low %v727_v38, %v731_v39  ;;  %v688_v38 = vld [vmem:[#allocation3 + $0x58] sm:$0xff] }
  0xfb   : > { %v692_v39 = vld [vmem:[#allocation3 + $0x78] sm:$0xff] }
  0xfc   : > { %v537_v57 = vadd.f32 %v4146_v52, %v529_v50  ;;  %1159 = vmatprep.subr.bf16.mxu1 %v4206_v43  ;;  %v735_v50 = vld [vmem:[#allocation3 + $0x1d0] sm:$0xff]  ;;  %v4168_v43 = vcombine.high %v688_v38, %v692_v39 }
  0xfd   : > { %v545_v48 = vpop.permute.xlu1 %544  ;;  %v523_v49 = vpop.permute.xlu0 %522  ;;  %1160 = vmatpush1.bf16.msra.mxu1 %v4205_v44  ;;  %v696_v44 = vld [vmem:[#allocation3 + $0x98] sm:$0xff] }
  0xfe   : > { %v530_v51 = vmul.f32 %v528_v45, %v523_v49  ;;  %v552_v58 = vmul.f32 %v550_v54, %v545_v48  ;;  %v553_v3 = vadd.f32 %v551_v62, %v537_v57  ;;  %v733_v45 = vld [vmem:[#allocation3 + $0x1c0] sm:$0xff]  ;;  %v682_v57 = vld [vmem:[#allocation3 + $0x28] sm:$0xff] }
  0xff   : > { %v737_v48 = vld [vmem:[#allocation3 + $0x1e0] sm:$0xff] }
 0x100   : > { %v538_v55 = vadd.f32 %v4146_v52, %v530_v51  ;;  %v4210_v49 = vcombine.high %v733_v45, %v737_v48  ;;  %v739_v51 = vld [vmem:[#allocation3 + $0x1f0] sm:$0xff]  ;;  %v4209_v52 = vcombine.low %v733_v45, %v737_v48  ;;  %v700_v45 = vld [vmem:[#allocation3 + $0xb8] sm:$0xff]  ;;  %v4167_v48 = vcombine.low %v688_v38, %v692_v39 }
 0x101   : > { %v4214_v54 = vcombine.high %v735_v50, %v739_v51  ;;  %v4781_v38 = vld [vmem:[#allocation6 + $0xe0] ss:$16 sps:$4 sm:$0xff]   ;;  %v4784_v39 = vld [vmem:[#allocation6 + $0xe8] ss:$16 sps:$4 sm:$0xff]  }
 0x102   : > { %v561_v59 = vpop.permute.xlu1 %560  ;;  %v557_v60 = vpop.permute.xlu0 %556  ;;  %v554_v63 = vadd.f32 %v552_v58, %v538_v55  ;;  %v4213_v55 = vcombine.low %v735_v50, %v739_v51  ;;  %v704_v50 = vld [vmem:[#allocation3 + $0xd8] sm:$0xff] }
 0x103   : > { %v568_v0 = vmul.f32 %v566_v56, %v561_v59  ;;  %v567_v2 = vmul.f32 %v566_v56, %v557_v60  ;;  %1161 = vmatprep.subr.bf16.mxu1 %v4214_v54  ;;  %v678_v56 = vld [vmem:[#allocation3 + $0x8] sm:$0xff]  ;;  %v4147_v60 = vld [vmem:[%s5851_s4] ss:$0 sm:$0xff]  ;;  %v708_v51 = vld [vmem:[#allocation3 + $0xf8] sm:$0xff] }
 0x104   : > { %1162 = vmatpush1.bf16.msra.mxu1 %v4213_v55  ;;  %v4156_v58 = vcombine.high %v678_v56, %v682_v57  ;;  %v4155_v59 = vcombine.low %v678_v56, %v682_v57  ;;  %v4184_v54 = vcombine.high %v704_v50, %v708_v51  ;;  %v712_v55 = vld [vmem:[#allocation3 + $0x118] sm:$0xff]  ;;  %v4183_v57 = vcombine.low %v704_v50, %v708_v51  ;;  %v4793_v50 = vld [vmem:[#allocation6 + $0x120] ss:$16 sps:$4 sm:$0xff]  }
 0x105   : > { %v570_v6 = vadd.f32 %v568_v0, %v554_v63  ;;  %v569_v7 = vadd.f32 %v567_v2, %v553_v3  ;;  %v716_v56 = vld [vmem:[#allocation3 + $0x138] sm:$0xff] }
 0x106   : > { %v4796_v51 = vld [vmem:[#allocation6 + $0x128] ss:$16 sps:$4 sm:$0xff]  }
 0x107   : > { %v573_v4 = vpop.permute.xlu1 %572  ;;  %v577_v5 = vpop.permute.xlu0 %576 }
 0x108   : > { %v583_v8 = vmul.f32 %v582_v61, %v573_v4  ;;  %v584_v9 = vmul.f32 %v582_v61, %v577_v5  ;;  %v686_v4 = vld [vmem:[#allocation3 + $0x48] sm:$0xff] }
 0x109   : > { %v690_v5 = vld [vmem:[#allocation3 + $0x68] sm:$0xff] }
 0x10a   : > { %v585_v10 = vadd.f32 %v583_v8, %v569_v7  ;;  %v586_v14 = vadd.f32 %v584_v9, %v570_v6  ;;  %v4164_v9 = vcombine.high %v686_v4, %v690_v5  ;;  %v4163_v15 = vcombine.low %v686_v4, %v690_v5  ;;  %v740_v4 = vld [vmem:[#allocation3 + $0x1f8] sm:$0xff] }
 0x10c   : > { %v587_v17 = vmax.f32 %v585_v10, 0.0  ;;  %v588_v18 = vmax.f32 %v586_v14, 0.0  ;;  %v694_v10 = vld [vmem:[#allocation3 + $0x88] sm:$0xff] }
 0x10d   : > { %v698_v14 = vld [vmem:[#allocation3 + $0xa8] sm:$0xff] }
 0x10e   : > { %v589_v19 = vpack.c.bf16 %v588_v18, %v587_v17  ;;  %v4172_v16 = vcombine.high %v694_v10, %v698_v14  ;;  %v702_v17 = vld [vmem:[#allocation3 + $0xc8] sm:$0xff] }
 0x10f   : > { %v706_v18 = vld [vmem:[#allocation3 + $0xe8] sm:$0xff] }
 0x110   : > { %4593 = vmatmul.mubr.msk.bf16.vlgmr.msra.gmra.mrb[0].mxu0 %vm629_vm1, %v589_v19  ;;  %v4171_v19 = vcombine.low %v694_v10, %v698_v14  ;;  %v4744_v10 = vld [vmem:[#allocation6 + $0xc] ss:$16 sps:$4 sm:$0xff]   ;;  %v4739_v14 = vld [vmem:[#allocation6] ss:$16 sps:$4 sm:$0xff]  }
 0x111   : > { %1062 = vmatpush1.bf16.msra.mxu0 %v4153_v13  ;;  %1093 = vmatprep.mubr.bf16.mxu0 %v5417_v1  ;;  %v4194_v13 = vcombine.high %v717_v33, %v721_v11  ;;  %v734_v33 = vld [vmem:[#allocation3 + $0x1c8] sm:$0xff] }
 0x112   : > { %1063 = vmatprep.subr.bf16.mxu0 %v4162_v20  ;;  %v4180_v20 = vcombine.high %v702_v17, %v706_v18  ;;  %v738_v11 = vld [vmem:[#allocation3 + $0x1e8] sm:$0xff] }
 0x113   : > { %v4211_v36 = vcombine.low %v734_v33, %v738_v11 }
 0x115   : > { %1064 = vmatpush1.bf16.msra.mxu0 %v4161_v23  ;;  %v4179_v23 = vcombine.low %v702_v17, %v706_v18  ;;  %v4750_v17 = vld [vmem:[#allocation6 + $0x2c] ss:$16 sps:$4 sm:$0xff]   ;;  %v4745_v18 = vld [vmem:[#allocation6 + $0x20] ss:$16 sps:$4 sm:$0xff]  }
 0x116   : > { %1065 = vmatprep.subr.bf16.mxu0 %v4170_v24  ;;  %v4188_v24 = vcombine.high %v710_v21, %v714_v22 }
 0x119   : > { %1066 = vmatpush1.bf16.msra.mxu0 %v4169_v27  ;;  %v4187_v27 = vcombine.low %v710_v21, %v714_v22  ;;  %v4756_v21 = vld [vmem:[#allocation6 + $0x4c] ss:$16 sps:$4 sm:$0xff]   ;;  %v4751_v22 = vld [vmem:[#allocation6 + $0x40] ss:$16 sps:$4 sm:$0xff]  }
 0x11a   : > { %1067 = vmatprep.subr.bf16.mxu0 %v4178_v28  ;;  %v4196_v28 = vcombine.high %v718_v25, %v722_v26 }
 0x11d   : > { %1068 = vmatpush1.bf16.msra.mxu0 %v4177_v31  ;;  %v4195_v31 = vcombine.low %v718_v25, %v722_v26  ;;  %v4757_v25 = vld [vmem:[#allocation6 + $0x60] ss:$16 sps:$4 sm:$0xff]   ;;  %v4760_v26 = vld [vmem:[#allocation6 + $0x68] ss:$16 sps:$4 sm:$0xff]  }
 0x11e   : > { %1069 = vmatprep.subr.bf16.mxu0 %v4186_v32  ;;  %v4204_v32 = vcombine.high %v726_v29, %v730_v30 }
 0x121   : > { %1070 = vmatpush1.bf16.msra.mxu0 %v4185_v12  ;;  %v4203_v12 = vcombine.low %v726_v29, %v730_v30  ;;  %v4763_v29 = vld [vmem:[#allocation6 + $0x80] ss:$16 sps:$4 sm:$0xff]   ;;  %v4766_v30 = vld [vmem:[#allocation6 + $0x88] ss:$16 sps:$4 sm:$0xff]  }
 0x122   : > { %1071 = vmatprep.subr.bf16.mxu0 %v4194_v13  ;;  %v4212_v13 = vcombine.high %v734_v33, %v738_v11  ;;  %v4769_v33 = vld [vmem:[#allocation6 + $0xa0] ss:$16 sps:$4 sm:$0xff]   ;;  %v4772_v11 = vld [vmem:[#allocation6 + $0xa8] ss:$16 sps:$4 sm:$0xff]  }
 0x125   : > { %1072 = vmatpush1.bf16.msra.mxu0 %v4193_v34  ;;  %v680_v34 = vld [vmem:[#allocation3 + $0x18] sm:$0xff] }
 0x126   : > { %1073 = vmatprep.subr.bf16.mxu0 %v4202_v37  ;;  %v4160_v37 = vcombine.high %v680_v34, %v684_v35 }
 0x129   : > { %1074 = vmatpush1.bf16.msra.mxu0 %v4201_v42  ;;  %v4159_v42 = vcombine.low %v680_v34, %v684_v35  ;;  %v4778_v34 = vld [vmem:[#allocation6 + $0xc8] ss:$16 sps:$4 sm:$0xff]   ;;  %v4780_v35 = vld [vmem:[#allocation6 + $0xcc] ss:$16 sps:$4 sm:$0xff]  }
 0x12a   : > { %1075 = vmatprep.subr.bf16.mxu0 %v4210_v49  ;;  %v4176_v49 = vcombine.high %v696_v44, %v700_v45 }
 0x12d   : > { %1076 = vmatpush1.bf16.msra.mxu0 %v4209_v52  ;;  %v4175_v52 = vcombine.low %v696_v44, %v700_v45  ;;  %v4787_v44 = vld [vmem:[#allocation6 + $0x100] ss:$16 sps:$4 sm:$0xff]   ;;  %v4790_v45 = vld [vmem:[#allocation6 + $0x108] ss:$16 sps:$4 sm:$0xff]  }
 0x12e   : > { %1104 = vmatprep.subr.bf16.mxu0 %v4156_v58  ;;  %v4192_v58 = vcombine.high %v712_v55, %v716_v56 }
 0x1e3   : > { %v667_v61 = vpop.f32.mrb[0].mxu0 }
 0x1e4   : > { %v668_v62 = vadd.f32 %v4147_v60, %v667_v61  ;;  %v4594_v63 = vpop.f32.mrb[1].mxu0  ;;  %v4191_v61 = vcombine.low %v712_v55, %v716_v56  ;;  %v4799_v55 = vld [vmem:[#allocation6 + $0x140] ss:$16 sps:$4 sm:$0xff]   ;;  %v4802_v56 = vld [vmem:[#allocation6 + $0x148] ss:$16 sps:$4 sm:$0xff]  }
 0x1e5   : > { %v670_v0 = vpop.f32.mrb[2].mxu0  ;;  %v732_v63 = vld [vmem:[#allocation3 + $0x1b8] sm:$0xff] }
 0x1e6   : > { %v671_v2 = vadd.f32 %v4147_v60, %v670_v0  ;;  %v4595_v3 = vpop.f32.mrb[3].mxu0  ;;  %v674_v6 = vmax.f32 %v668_v62, 0.0  ;;  %v724_v60 = vld [vmem:[#allocation3 + $0x178] sm:$0xff] }
 0x1e7   : > { %v728_v62 = vld [vmem:[#allocation3 + $0x198] sm:$0xff] }
 0x1e8   : > { %v675_v7 = vmax.f32 %v671_v2, 0.0  ;;  %v4208_v2 = vcombine.high %v728_v62, %v732_v63  ;;  %v736_v3 = vld [vmem:[#allocation3 + $0x1d8] sm:$0xff]  ;;  %v4207_v5 = vcombine.low %v728_v62, %v732_v63  ;;  %v4811_v62 = vld [vmem:[#allocation6 + $0x180] ss:$16 sps:$4 sm:$0xff]  }
 0x1e9   : > { %v4814_v63 = vld [vmem:[#allocation6 + $0x188] ss:$16 sps:$4 sm:$0xff]  }
 0x1ea   : > { %v5693_v8 = vpack.c.bf16 %v675_v7, %v674_v6  ;;  %v4216_v6 = vcombine.high %v736_v3, %v740_v4  ;;  %v4215_v7 = vcombine.low %v736_v3, %v740_v4  ;;  %v4817_v3 = vld [vmem:[#allocation6 + $0x1a0] ss:$16 sps:$4 sm:$0xff]   ;;  %v4820_v4 = vld [vmem:[#allocation6 + $0x1a8] ss:$16 sps:$4 sm:$0xff]  }
 0x1ec   : > { %1094 = vmatmul.mubr.bf16.vlgmr.msra.gmra.mrb[4].mxu0 %v5693_v8  ;;  %1180 = vmatmul.mubr.bf16.vlgmr.msra.gmra.mrb[0].mxu1 %v5693_v8 }
 0x1ed   : > { %1105 = vmatpush1.bf16.msra.mxu0 %v4155_v59  ;;  %1136 = vmatprep.mubr.bf16.mxu0 %v5417_v1  ;;  %v720_v59 = vld [vmem:[#allocation3 + $0x158] sm:$0xff] }
 0x1ee   : > { %1106 = vmatprep.subr.bf16.mxu0 %v4164_v9  ;;  %v4199_v0 = vcombine.low %v720_v59, %v724_v60  ;;  %v4741_v9 = vld [vmem:[#allocation6 + $0x4] ss:$16 sps:$4 sm:$0xff]  }
 0x1ef   : > { %3031 = vmatprep.subr.bf16.mxu1 %v4741_v9  ;;  %v4826_v9 = vld [vmem:[#allocation6 + $0x1c8] ss:$16 sps:$4 sm:$0xff]  }
 0x1f0   : > { %3032 = vmatpush1.bf16.msra.mxu1 %v4739_v14  ;;  %v4831_v14 = vld [vmem:[#allocation6 + $0x1e4] ss:$16 sps:$4 sm:$0xff]  }
 0x1f1   : > { %1107 = vmatpush1.bf16.msra.mxu0 %v4163_v15  ;;  %v4742_v15 = vld [vmem:[#allocation6 + $0x8] ss:$16 sps:$4 sm:$0xff]  }
 0x1f2   : > { %1108 = vmatprep.subr.bf16.mxu0 %v4172_v16  ;;  %v4747_v16 = vld [vmem:[#allocation6 + $0x24] ss:$16 sps:$4 sm:$0xff]  }
 0x1f3   : > { %3033 = vmatprep.subr.bf16.mxu1 %v4747_v16  ;;  %v4834_v16 = vld [vmem:[#allocation6 + $0x1ec] ss:$16 sps:$4 sm:$0xff]  }
 0x1f4   : > { %3034 = vmatpush1.bf16.msra.mxu1 %v4745_v18  ;;  %v4840_v18 = vld [vmem:[#allocation6 + $0x20c] ss:$16 sps:$4 sm:$0xff]  }
 0x1f5   : > { %1109 = vmatpush1.bf16.msra.mxu0 %v4171_v19  ;;  %v4748_v19 = vld [vmem:[#allocation6 + $0x28] ss:$16 sps:$4 sm:$0xff]  }
 0x1f6   : > { %1110 = vmatprep.subr.bf16.mxu0 %v4180_v20  ;;  %v4753_v20 = vld [vmem:[#allocation6 + $0x44] ss:$16 sps:$4 sm:$0xff]  }
 0x1f7   : > { %3035 = vmatprep.subr.bf16.mxu1 %v4753_v20 }
 0x1f8   : > { %3036 = vmatpush1.bf16.msra.mxu1 %v4751_v22 }
 0x1f9   : > { %1111 = vmatpush1.bf16.msra.mxu0 %v4179_v23  ;;  %v4759_v23 = vld [vmem:[#allocation6 + $0x64] ss:$16 sps:$4 sm:$0xff]  }
 0x1fa   : > { %1112 = vmatprep.subr.bf16.mxu0 %v4188_v24  ;;  %v4762_v24 = vld [vmem:[#allocation6 + $0x6c] ss:$16 sps:$4 sm:$0xff]   ;;  %3037 = vmatprep.subr.bf16.mxu1 %v4759_v23 }
 0x1fc   : > { %3038 = vmatpush1.bf16.msra.mxu1 %v4757_v25 }
 0x1fd   : > { %1113 = vmatpush1.bf16.msra.mxu0 %v4187_v27  ;;  %v4765_v27 = vld [vmem:[#allocation6 + $0x84] ss:$16 sps:$4 sm:$0xff]  }
 0x1fe   : > { %1114 = vmatprep.subr.bf16.mxu0 %v4196_v28  ;;  %v4768_v28 = vld [vmem:[#allocation6 + $0x8c] ss:$16 sps:$4 sm:$0xff]   ;;  %3039 = vmatprep.subr.bf16.mxu1 %v4765_v27 }
 0x200   : > { %3040 = vmatpush1.bf16.msra.mxu1 %v4763_v29 }
 0x201   : > { %1115 = vmatpush1.bf16.msra.mxu0 %v4195_v31  ;;  %v4771_v31 = vld [vmem:[#allocation6 + $0xa4] ss:$16 sps:$4 sm:$0xff]  }
 0x202   : > { %1116 = vmatprep.subr.bf16.mxu0 %v4204_v32  ;;  %v4774_v32 = vld [vmem:[#allocation6 + $0xac] ss:$16 sps:$4 sm:$0xff]   ;;  %3041 = vmatprep.subr.bf16.mxu1 %v4771_v31 }
 0x204   : > { %3042 = vmatpush1.bf16.msra.mxu1 %v4769_v33 }
 0x205   : > { %1117 = vmatpush1.bf16.msra.mxu0 %v4203_v12  ;;  %v4777_v12 = vld [vmem:[#allocation6 + $0xc4] ss:$16 sps:$4 sm:$0xff]  }
 0x206   : > { %1118 = vmatprep.subr.bf16.mxu0 %v4212_v13  ;;  %v4775_v13 = vld [vmem:[#allocation6 + $0xc0] ss:$16 sps:$4 sm:$0xff]   ;;  %3043 = vmatprep.subr.bf16.mxu1 %v4777_v12 }
 0x208   : > { %3044 = vmatpush1.bf16.msra.mxu1 %v4775_v13 }
 0x209   : > { %1119 = vmatpush1.bf16.msra.mxu0 %v4211_v36  ;;  %v4783_v36 = vld [vmem:[#allocation6 + $0xe4] ss:$16 sps:$4 sm:$0xff]  }
 0x20a   : > { %1190 = vmatprep.subr.bf16.mxu0 %v4160_v37  ;;  %v4786_v37 = vld [vmem:[#allocation6 + $0xec] ss:$16 sps:$4 sm:$0xff]   ;;  %3045 = vmatprep.subr.bf16.mxu1 %v4783_v36 }
 0x20c   : > { %1137 = vmatmul.mubr.bf16.vlgmr.msra.gmra.mrb[8].mxu0 %v5693_v8  ;;  %3046 = vmatpush1.bf16.msra.mxu1 %v4781_v38 }
 0x20d   : > { %1191 = vmatpush1.bf16.msra.mxu0 %v4159_v42  ;;  %1222 = vmatprep.mubr.bf16.mxu0 %v5417_v1  ;;  %v4200_v1 = vcombine.high %v720_v59, %v724_v60  ;;  %v4789_v42 = vld [vmem:[#allocation6 + $0x104] ss:$16 sps:$4 sm:$0xff]   ;;  %v4805_v59 = vld [vmem:[#allocation6 + $0x160] ss:$16 sps:$4 sm:$0xff]   ;;  %v4808_v60 = vld [vmem:[#allocation6 + $0x168] ss:$16 sps:$4 sm:$0xff]  }
 0x20e   : > { %1192 = vmatprep.subr.bf16.mxu0 %v4168_v43  ;;  %v4792_v43 = vld [vmem:[#allocation6 + $0x10c] ss:$16 sps:$4 sm:$0xff]   ;;  %3047 = vmatprep.subr.bf16.mxu1 %v4789_v42 }
 0x210   : > { %3048 = vmatpush1.bf16.msra.mxu1 %v4787_v44 }
 0x211   : > { %1193 = vmatpush1.bf16.msra.mxu0 %v4167_v48  ;;  %v4795_v48 = vld [vmem:[#allocation6 + $0x124] ss:$16 sps:$4 sm:$0xff]  }
 0x212   : > { %1194 = vmatprep.subr.bf16.mxu0 %v4176_v49  ;;  %v4798_v49 = vld [vmem:[#allocation6 + $0x12c] ss:$16 sps:$4 sm:$0xff]   ;;  %3049 = vmatprep.subr.bf16.mxu1 %v4795_v48 }
 0x214   : > { %3050 = vmatpush1.bf16.msra.mxu1 %v4793_v50 }
 0x215   : > { %1195 = vmatpush1.bf16.msra.mxu0 %v4175_v52  ;;  %v4801_v52 = vld [vmem:[#allocation6 + $0x144] ss:$16 sps:$4 sm:$0xff]  }
 0x216   : > { %1196 = vmatprep.subr.bf16.mxu0 %v4184_v54  ;;  %v4804_v54 = vld [vmem:[#allocation6 + $0x14c] ss:$16 sps:$4 sm:$0xff]   ;;  %3051 = vmatprep.subr.bf16.mxu1 %v4801_v52 }
 0x218   : > { %3052 = vmatpush1.bf16.msra.mxu1 %v4799_v55 }
 0x219   : > { %1197 = vmatpush1.bf16.msra.mxu0 %v4183_v57  ;;  %v4807_v57 = vld [vmem:[#allocation6 + $0x164] ss:$16 sps:$4 sm:$0xff]  }
 0x21a   : > { %1198 = vmatprep.subr.bf16.mxu0 %v4192_v58  ;;  %v4810_v58 = vld [vmem:[#allocation6 + $0x16c] ss:$16 sps:$4 sm:$0xff]   ;;  %3053 = vmatprep.subr.bf16.mxu1 %v4807_v57 }
 0x21c   : > { %3054 = vmatpush1.bf16.msra.mxu1 %v4805_v59 }
 0x21d   : > { %1199 = vmatpush1.bf16.msra.mxu0 %v4191_v61  ;;  %v4813_v61 = vld [vmem:[#allocation6 + $0x184] ss:$16 sps:$4 sm:$0xff]  }
 0x21e   : > { %1200 = vmatprep.subr.bf16.mxu0 %v4200_v1  ;;  %v4816_v1 = vld [vmem:[#allocation6 + $0x18c] ss:$16 sps:$4 sm:$0xff]   ;;  %3055 = vmatprep.subr.bf16.mxu1 %v4813_v61 }
 0x220   : > { %3056 = vmatpush1.bf16.msra.mxu1 %v4811_v62 }
 0x221   : > { %1201 = vmatpush1.bf16.msra.mxu0 %v4199_v0  ;;  %v4819_v0 = vld [vmem:[#allocation6 + $0x1a4] ss:$16 sps:$4 sm:$0xff]  }
 0x222   : > { %1202 = vmatprep.subr.bf16.mxu0 %v4208_v2  ;;  %v4822_v2 = vld [vmem:[#allocation6 + $0x1ac] ss:$16 sps:$4 sm:$0xff]   ;;  %3057 = vmatprep.subr.bf16.mxu1 %v4819_v0 }
 0x224   : > { %3058 = vmatpush1.bf16.msra.mxu1 %v4817_v3  ;;  %v5422_v3 = vmov 1966171168  }
 0x225   : > { %1203 = vmatpush1.bf16.msra.mxu0 %v4207_v5  ;;  %v4825_v5 = vld [vmem:[#allocation6 + $0x1c4] ss:$16 sps:$4 sm:$0xff]  }
 0x226   : > { %1204 = vmatprep.subr.bf16.mxu0 %v4216_v6  ;;  %v4828_v6 = vld [vmem:[#allocation6 + $0x1cc] ss:$16 sps:$4 sm:$0xff]   ;;  %3059 = vmatprep.subr.bf16.mxu1 %v4825_v5 }
 0x229   : > { %1205 = vmatpush1.bf16.msra.mxu0 %v4215_v7  ;;  %v4823_v7 = vld [vmem:[#allocation6 + $0x1c0] ss:$16 sps:$4 sm:$0xff]  }
 0x22a   : > { %3195 = vmatprep.subr.bf16.mxu0 %v4744_v10  ;;  %3060 = vmatpush1.bf16.msra.mxu1 %v4823_v7  ;;  %v4829_v10 = vld [vmem:[#allocation6 + $0x1e0] ss:$16 sps:$4 sm:$0xff]  }
 0x22b   : > { %3061 = vmatprep.subr.bf16.mxu1 %v4831_v14 }
 0x22c   : > { %1223 = vmatmul.mubr.bf16.vlgmr.msra.gmra.mrb[12].mxu0 %v5693_v8  ;;  %v4754_v8 = vld [vmem:[#allocation6 + $0x48] ss:$16 sps:$4 sm:$0xff]  }
 0x22d   : > { %3196 = vmatpush1.bf16.msra.mxu0 %v4742_v15  ;;  %v4832_v15 = vld [vmem:[#allocation6 + $0x1e8] ss:$16 sps:$4 sm:$0xff]  }
 0x22e   : > { %3197 = vmatprep.subr.bf16.mxu0 %v4750_v17  ;;  %3062 = vmatpush1.bf16.msra.mxu1 %v4829_v10  ;;  %v4837_v17 = vld [vmem:[#allocation6 + $0x204] ss:$16 sps:$4 sm:$0xff]  }
 0x22f   : > { %3072 = vmatprep.subr.bf16.mxu1 %v4837_v17 }
 0x231   : > { %3198 = vmatpush1.bf16.msra.mxu0 %v4748_v19 }
 0x232   : > { %3199 = vmatprep.subr.bf16.mxu0 %v4756_v21 }
 0x235   : > { %3200 = vmatpush1.bf16.msra.mxu0 %v4754_v8 }
 0x236   : > { %3201 = vmatprep.subr.bf16.mxu0 %v4762_v24 }
 0x239   : > { %3202 = vmatpush1.bf16.msra.mxu0 %v4760_v26 }
 0x23a   : > { %3203 = vmatprep.subr.bf16.mxu0 %v4768_v28 }
 0x23d   : > { %3204 = vmatpush1.bf16.msra.mxu0 %v4766_v30 }
 0x23e   : > { %3205 = vmatprep.subr.bf16.mxu0 %v4774_v32 }
 0x241   : > { %3206 = vmatpush1.bf16.msra.mxu0 %v4772_v11 }
 0x242   : > { %3207 = vmatprep.subr.bf16.mxu0 %v4780_v35 }
 0x245   : > { %3208 = vmatpush1.bf16.msra.mxu0 %v4778_v34 }
 0x246   : > { %3209 = vmatprep.subr.bf16.mxu0 %v4786_v37 }
 0x249   : > { %3210 = vmatpush1.bf16.msra.mxu0 %v4784_v39 }
 0x24a   : > { %3211 = vmatprep.subr.bf16.mxu0 %v4792_v43 }
 0x24d   : > { %3212 = vmatpush1.bf16.msra.mxu0 %v4790_v45 }
 0x24e   : > { %3213 = vmatprep.subr.bf16.mxu0 %v4798_v49 }
 0x251   : > { %3214 = vmatpush1.bf16.msra.mxu0 %v4796_v51 }
 0x252   : > { %3215 = vmatprep.subr.bf16.mxu0 %v4804_v54 }
 0x255   : > { %3216 = vmatpush1.bf16.msra.mxu0 %v4802_v56 }
 0x256   : > { %3217 = vmatprep.subr.bf16.mxu0 %v4810_v58 }
 0x259   : > { %3218 = vmatpush1.bf16.msra.mxu0 %v4808_v60 }
 0x25a   : > { %3219 = vmatprep.subr.bf16.mxu0 %v4816_v1 }
 0x25d   : > { %3220 = vmatpush1.bf16.msra.mxu0 %v4814_v63 }
 0x25e   : > { %3221 = vmatprep.subr.bf16.mxu0 %v4822_v2 }
 0x261   : > { %3222 = vmatpush1.bf16.msra.mxu0 %v4820_v4  ;;  %v1306_v4 = vunpack.c.l.s4 %v5422_v3  ;;  %v4847_v3 = vld [vmem:[#allocation6 + $0x240] ss:$16 sps:$4 sm:$0xff]  }
 0x262   : > { %3223 = vmatprep.subr.bf16.mxu0 %v4828_v6 }
 0x263   : > { %v1307_v10 = vunpack.c.0.s8 %v1306_v4  ;;  %v4850_v4 = vld [vmem:[#allocation6 + $0x248] ss:$16 sps:$4 sm:$0xff]  }
 0x265   : > { %3224 = vmatpush1.bf16.msra.mxu0 %v4826_v9 }
 0x266   : > { %3225 = vmatprep.subr.bf16.mxu0 %v4834_v16 }
 0x269   : > { %3226 = vmatpush1.bf16.msra.mxu0 %v4832_v15 }
 0x26a   : > { %3236 = vmatprep.subr.bf16.mxu0 %v4840_v18  ;;  %v1310_v18 = vsub.s32 %v1307_v10, %v5662_v40  ;;  %v4861_v10 = vld [vmem:[#allocation6 + $0x284] ss:$16 sps:$4 sm:$0xff]  }
 0x2bf   : > { %v1095_v19 = vpop.f32.mrb[4].mxu0  ;;  %v1181_v20 = vpop.f32.mrb[0].mxu1 }
 0x2c0   : > { %v1097_v21 = vpop.f32.mrb[5].mxu0  ;;  %v1183_v22 = vpop.f32.mrb[1].mxu1 }
 0x2c1   : > { %v1099_v8 = vpop.f32.mrb[6].mxu0  ;;  %v1185_v23 = vpop.f32.mrb[2].mxu1 }
 0x2c2   : > { %v1233_v24 = vmax.f32 %v1095_v19, %v1099_v8  ;;  %v1261_v25 = vmax.f32 %v1181_v20, %v1185_v23  ;;  %v1101_v26 = vpop.f32.mrb[7].mxu0  ;;  %v1187_v27 = vpop.f32.mrb[3].mxu1 }
 0x2c3   : > { %v1240_v28 = vmax.f32 %v1097_v21, %v1101_v26  ;;  %v1268_v29 = vmax.f32 %v1183_v22, %v1187_v27 }
 0x2c4   : > { %v1234_v30 = vrot.slane %v1233_v24, 4  ;;  %v1262_v31 = vrot.slane %v1261_v25, 4 }
 0x2c5   : > { %v1241_v32 = vrot.slane %v1240_v28, 4  ;;  %v1269_v33 = vrot.slane %v1268_v29, 4 }
 0x2c6   : > { %v1235_v11 = vmax.f32 %v1233_v24, %v1234_v30  ;;  %v1263_v12 = vmax.f32 %v1261_v25, %v1262_v31 }
 0x2c7   : > { %v1242_v13 = vmax.f32 %v1240_v28, %v1241_v32  ;;  %v1270_v34 = vmax.f32 %v1268_v29, %v1269_v33 }
 0x2c8   : > { %v1236_v35 = vrot.slane %v1235_v11, 2  ;;  %v1264_v36 = vrot.slane %v1263_v12, 2 }
 0x2c9   : > { %v1243_v37 = vrot.slane %v1242_v13, 2  ;;  %v1271_v38 = vrot.slane %v1270_v34, 2 }
 0x2ca   : > { %v1237_v39 = vmax.f32 %v1235_v11, %v1236_v35  ;;  %v1265_v42 = vmax.f32 %v1263_v12, %v1264_v36 }
 0x2cb   : > { %v1244_v43 = vmax.f32 %v1242_v13, %v1243_v37  ;;  %v1272_v44 = vmax.f32 %v1270_v34, %v1271_v38 }
 0x2cc   : > { %v1238_v45 = vrot.slane %v1237_v39, 1  ;;  %v1266_v48 = vrot.slane %v1265_v42, 1 }
 0x2cd   : > { %v1245_v49 = vrot.slane %v1244_v43, 1  ;;  %v1273_v50 = vrot.slane %v1272_v44, 1 }
 0x2ce   : > { %v1239_v51 = vmax.f32 %v1237_v39, %v1238_v45  ;;  %v1267_v52 = vmax.f32 %v1265_v42, %v1266_v48  ;;  %v1421_v48 = vld [vmem:[%s5853_s6] sm:$0xff] }
 0x2cf   : > { %v1246_v54 = vmax.f32 %v1244_v43, %v1245_v49  ;;  %v1274_v55 = vmax.f32 %v1272_v44, %v1273_v50 }
 0x2d1   : > { %v1301_v56 = vcombine.low %v1239_v51, %v1246_v54  ;;  %v1303_v57 = vcombine.low %v1267_v52, %v1274_v55 }
 0x2d3   : > { %v1311_v21 = vrot.slane %v1301_v56, %v1310_v18  ;;  %v1325_v39 = vrot.slane %v1303_v57, %v1310_v18  ;;  %v4835_v57 = vld [vmem:[#allocation6 + $0x200] ss:$16 sps:$4 sm:$0xff]  }
 0x2df   : > { %v1138_v58 = vpop.f32.mrb[8].mxu0 }
 0x2e0   : > { %v1140_v59 = vpop.f32.mrb[9].mxu0 }
 0x2e1   : > { %v1142_v60 = vpop.f32.mrb[10].mxu0 }
 0x2e2   : > { %v1247_v61 = vmax.f32 %v1138_v58, %v1142_v60  ;;  %v1144_v1 = vpop.f32.mrb[11].mxu0  ;;  %v4838_v58 = vld [vmem:[#allocation6 + $0x208] ss:$16 sps:$4 sm:$0xff]   ;;  %v4843_v60 = vld [vmem:[#allocation6 + $0x224] ss:$16 sps:$4 sm:$0xff]  }
 0x2e3   : > { %v1254_v62 = vmax.f32 %v1140_v59, %v1144_v1 }
 0x2e4   : > { %v1248_v63 = vrot.slane %v1247_v61, 4 }
 0x2e5   : > { %v1255_v0 = vrot.slane %v1254_v62, 4 }
 0x2e6   : > { %v1249_v2 = vmax.f32 %v1247_v61, %v1248_v63  ;;  %v4846_v61 = vld [vmem:[#allocation6 + $0x22c] ss:$16 sps:$4 sm:$0xff]   ;;  %v4844_v63 = vld [vmem:[#allocation6 + $0x228] ss:$16 sps:$4 sm:$0xff]  }
 0x2e7   : > { %v1256_v5 = vmax.f32 %v1254_v62, %v1255_v0  ;;  %v4841_v62 = vld [vmem:[#allocation6 + $0x220] ss:$16 sps:$4 sm:$0xff]   ;;  %v4849_v0 = vld [vmem:[#allocation6 + $0x244] ss:$16 sps:$4 sm:$0xff]  }
 0x2e8   : > { %v1250_v6 = vrot.slane %v1249_v2, 2 }
 0x2e9   : > { %v1257_v7 = vrot.slane %v1256_v5, 2 }
 0x2ea   : > { %v1251_v9 = vmax.f32 %v1249_v2, %v1250_v6  ;;  %v4852_v2 = vld [vmem:[#allocation6 + $0x24c] ss:$16 sps:$4 sm:$0xff]  }
 0x2eb   : > { %v1258_v14 = vmax.f32 %v1256_v5, %v1257_v7  ;;  %v4855_v5 = vld [vmem:[#allocation6 + $0x264] ss:$16 sps:$4 sm:$0xff]   ;;  %v4858_v6 = vld [vmem:[#allocation6 + $0x26c] ss:$16 sps:$4 sm:$0xff]   ;;  %v4853_v7 = vld [vmem:[#allocation6 + $0x260] ss:$16 sps:$4 sm:$0xff]  }
 0x2ec   : > { %v1252_v15 = vrot.slane %v1251_v9, 1 }
 0x2ed   : > { %v1259_v16 = vrot.slane %v1258_v14, 1 }
 0x2ee   : > { %v1253_v17 = vmax.f32 %v1251_v9, %v1252_v15  ;;  %v4856_v9 = vld [vmem:[#allocation6 + $0x268] ss:$16 sps:$4 sm:$0xff]   ;;  %v4859_v15 = vld [vmem:[#allocation6 + $0x280] ss:$16 sps:$4 sm:$0xff]  }
 0x2ef   : > { %v1260_v19 = vmax.f32 %v1258_v14, %v1259_v16  ;;  %v4864_v14 = vld [vmem:[#allocation6 + $0x28c] ss:$16 sps:$4 sm:$0xff]   ;;  %v4862_v16 = vld [vmem:[#allocation6 + $0x288] ss:$16 sps:$4 sm:$0xff]  }
 0x2f1   : > { %v1302_v20 = vcombine.low %v1253_v17, %v1260_v19  ;;  %v4867_v17 = vld [vmem:[#allocation6 + $0x2a4] ss:$16 sps:$4 sm:$0xff]   ;;  %v4865_v19 = vld [vmem:[#allocation6 + $0x2a0] ss:$16 sps:$4 sm:$0xff]  }
 0x2f3   : > { %v1318_v22 = vrot.slane %v1302_v20, %v1310_v18  ;;  %v4868_v20 = vld [vmem:[#allocation6 + $0x2a8] ss:$16 sps:$4 sm:$0xff]  }
 0x2f5   : > { %v1333_v8 = vcombine.low %v1311_v21, %v1318_v22  ;;  %v4873_v21 = vld [vmem:[#allocation6 + $0x2c4] ss:$16 sps:$4 sm:$0xff]   ;;  %v4876_v22 = vld [vmem:[#allocation6 + $0x2cc] ss:$16 sps:$4 sm:$0xff]  }
 0x2f7   : > { %v1341_v44 = vrot.slane %v1333_v8, %v1310_v18  ;;  %v4871_v8 = vld [vmem:[#allocation6 + $0x2c0] ss:$16 sps:$4 sm:$0xff]  }
 0x2ff   : > { %v1224_v23 = vpop.f32.mrb[12].mxu0 }
 0x300   : > { %v1226_v24 = vpop.f32.mrb[13].mxu0 }
 0x301   : > { %v1228_v25 = vpop.f32.mrb[14].mxu0 }
 0x302   : > { %v1275_v26 = vmax.f32 %v1224_v23, %v1228_v25  ;;  %v1230_v27 = vpop.f32.mrb[15].mxu0  ;;  %v4874_v23 = vld [vmem:[#allocation6 + $0x2c8] ss:$16 sps:$4 sm:$0xff]   ;;  %v4882_v25 = vld [vmem:[#allocation6 + $0x2ec] ss:$16 sps:$4 sm:$0xff]  }
 0x303   : > { %v1282_v28 = vmax.f32 %v1226_v24, %v1230_v27  ;;  %v4879_v24 = vld [vmem:[#allocation6 + $0x2e4] ss:$16 sps:$4 sm:$0xff]   ;;  %v4880_v27 = vld [vmem:[#allocation6 + $0x2e8] ss:$16 sps:$4 sm:$0xff]  }
 0x304   : > { %v1276_v29 = vrot.slane %v1275_v26, 4 }
 0x305   : > { %v1283_v30 = vrot.slane %v1282_v28, 4 }
 0x306   : > { %v1277_v31 = vmax.f32 %v1275_v26, %v1276_v29  ;;  %v4877_v26 = vld [vmem:[#allocation6 + $0x2e0] ss:$16 sps:$4 sm:$0xff]   ;;  %v4888_v29 = vld [vmem:[#allocation6 + $0x30c] ss:$16 sps:$4 sm:$0xff]  }
 0x307   : > { %v1284_v32 = vmax.f32 %v1282_v28, %v1283_v30  ;;  %v4885_v28 = vld [vmem:[#allocation6 + $0x304] ss:$16 sps:$4 sm:$0xff]   ;;  %v4883_v30 = vld [vmem:[#allocation6 + $0x300] ss:$16 sps:$4 sm:$0xff]  }
 0x308   : > { %v1278_v33 = vrot.slane %v1277_v31, 2 }
 0x309   : > { %v1285_v11 = vrot.slane %v1284_v32, 2 }
 0x30a   : > { %v1279_v12 = vmax.f32 %v1277_v31, %v1278_v33  ;;  %v4886_v31 = vld [vmem:[#allocation6 + $0x308] ss:$16 sps:$4 sm:$0xff]   ;;  %v4894_v33 = vld [vmem:[#allocation6 + $0x32c] ss:$16 sps:$4 sm:$0xff]  }
 0x30b   : > { %v1286_v13 = vmax.f32 %v1284_v32, %v1285_v11  ;;  %v4891_v32 = vld [vmem:[#allocation6 + $0x324] ss:$16 sps:$4 sm:$0xff]   ;;  %v4889_v11 = vld [vmem:[#allocation6 + $0x320] ss:$16 sps:$4 sm:$0xff]  }
 0x30c   : > { %v1280_v34 = vrot.slane %v1279_v12, 1 }
 0x30d   : > { %v1287_v35 = vrot.slane %v1286_v13, 1 }
 0x30e   : > { %v1281_v36 = vmax.f32 %v1279_v12, %v1280_v34  ;;  %v4892_v12 = vld [vmem:[#allocation6 + $0x328] ss:$16 sps:$4 sm:$0xff]   ;;  %v4900_v34 = vld [vmem:[#allocation6 + $0x34c] ss:$16 sps:$4 sm:$0xff]  }
 0x30f   : > { %v1288_v37 = vmax.f32 %v1286_v13, %v1287_v35  ;;  %v4897_v13 = vld [vmem:[#allocation6 + $0x344] ss:$16 sps:$4 sm:$0xff]   ;;  %v4895_v35 = vld [vmem:[#allocation6 + $0x340] ss:$16 sps:$4 sm:$0xff]  }
 0x311   : > { %v1304_v38 = vcombine.low %v1281_v36, %v1288_v37  ;;  %v4898_v36 = vld [vmem:[#allocation6 + $0x348] ss:$16 sps:$4 sm:$0xff]   ;;  %v4903_v37 = vld [vmem:[#allocation6 + $0x364] ss:$16 sps:$4 sm:$0xff]  }
 0x313   : > { %v1332_v42 = vrot.slane %v1304_v38, %v1310_v18  ;;  %v4906_v38 = vld [vmem:[#allocation6 + $0x36c] ss:$16 sps:$4 sm:$0xff]  }
 0x315   : > { %v1334_v43 = vcombine.low %v1325_v39, %v1332_v42  ;;  %v4901_v39 = vld [vmem:[#allocation6 + $0x360] ss:$16 sps:$4 sm:$0xff]   ;;  %v4904_v42 = vld [vmem:[#allocation6 + $0x368] ss:$16 sps:$4 sm:$0xff]  }
 0x317   : > { %v1348_v45 = vrot.slane %v1334_v43, %v1310_v18  ;;  %v4870_v18 = vld [vmem:[#allocation6 + $0x2ac] ss:$16 sps:$4 sm:$0xff]   ;;  %v4909_v43 = vld [vmem:[#allocation6 + $0x384] ss:$16 sps:$4 sm:$0xff]  }
 0x319   : > { %v1349_v49 = vcombine.low %v1341_v44, %v1348_v45  ;;  %v4912_v44 = vld [vmem:[#allocation6 + $0x38c] ss:$16 sps:$4 sm:$0xff]   ;;  %v4907_v45 = vld [vmem:[#allocation6 + $0x380] ss:$16 sps:$4 sm:$0xff]  }
 0x31b   : > { %v1422_v50 = vadd.f32 %v1421_v48, %v1349_v49  ;;  %v4910_v48 = vld [vmem:[#allocation6 + $0x388] ss:$16 sps:$4 sm:$0xff]   ;;  %v4915_v49 = vld [vmem:[#allocation6 + $0x3a4] ss:$16 sps:$4 sm:$0xff]  }
 0x31d   : > { %v5705_v51 = vmax.f32 %v1422_v50, 0.0  ;;  %v4918_v50 = vld [vmem:[#allocation6 + $0x3ac] ss:$16 sps:$4 sm:$0xff]  }
 0x31f   : > { %v1432_v52 = vrot.slane %v5705_v51, %v5672_v46  ;;  %v1428_v54 = vrot.slane %v5705_v51, %v5665_v41  ;;  %v1440_v55 = vrot.slane %v5705_v51, %v5681_v53 }
 0x321   : > { %v1466_v56 = vpack.c.bf16 %v1432_v52, %v1432_v52  ;;  %v1465_v59 = vpack.c.bf16 %v1428_v54, %v1428_v54  ;;  %v1468_v1 = vpack.c.bf16 %v1440_v55, %v1440_v55  ;;  %v4913_v52 = vld [vmem:[#allocation6 + $0x3a0] ss:$16 sps:$4 sm:$0xff]   ;;  %v4916_v54 = vld [vmem:[#allocation6 + $0x3a8] ss:$16 sps:$4 sm:$0xff]   ;;  %v4921_v55 = vld [vmem:[#allocation6 + $0x3c4] ss:$16 sps:$4 sm:$0xff]  }
 0x323   : > { %3063 = vmatprep.mubr.bf16.mxu1 %v1466_v56  ;;  %3227 = vmatprep.mubr.bf16.mxu0 %v1466_v56  ;;  %v4924_v56 = vld [vmem:[#allocation6 + $0x3cc] ss:$16 sps:$4 sm:$0xff]  }
 0x324   : > { %3064 = vmatmul.mubr.bf16.vlgmr.msra.gmra.mrb[4].mxu1 %v1465_v59  ;;  %3228 = vmatmul.mubr.bf16.vlgmr.msra.gmra.mrb[16].mxu0 %v1465_v59  ;;  %v4927_v59 = vld [vmem:[#allocation6 + $0x3e4] ss:$16 sps:$4 sm:$0xff]  }
 0x325   : > { %3073 = vmatpush1.bf16.msra.mxu1 %v4835_v57  ;;  %3237 = vmatpush1.bf16.msra.mxu0 %v4838_v58  ;;  %v4919_v57 = vld [vmem:[#allocation6 + $0x3c0] ss:$16 sps:$4 sm:$0xff]   ;;  %v4922_v58 = vld [vmem:[#allocation6 + $0x3c8] ss:$16 sps:$4 sm:$0xff]  }
 0x326   : > { %3104 = vmatprep.mubr.bf16.mxu1 %v1468_v1  ;;  %3268 = vmatprep.mubr.bf16.mxu0 %v1468_v1  ;;  %v4925_v1 = vld [vmem:[#allocation6 + $0x3e0] ss:$16 sps:$4 sm:$0xff]  }
 0x327   : > { %3074 = vmatprep.subr.bf16.mxu1 %v4843_v60  ;;  %3238 = vmatprep.subr.bf16.mxu0 %v4846_v61  ;;  %v4930_v60 = vld [vmem:[#allocation6 + $0x3ec] ss:$16 sps:$4 sm:$0xff]   ;;  %v1447_v61 = vsub.s32 5, %v5662_v40 }
 0x329   : > { %3075 = vmatpush1.bf16.msra.mxu1 %v4841_v62  ;;  %3239 = vmatpush1.bf16.msra.mxu0 %v4844_v63  ;;  %v4928_v62 = vld [vmem:[#allocation6 + $0x3e8] ss:$16 sps:$4 sm:$0xff]   ;;  %v1436_v63 = vrot.slane %v5705_v51, %v5675_v47 }
 0x32a   : > { %3076 = vmatprep.subr.bf16.mxu1 %v4849_v0  ;;  %3240 = vmatprep.subr.bf16.mxu0 %v4852_v2  ;;  %v4933_v0 = vld [vmem:[#allocation6 + $0x404] ss:$16 sps:$4 sm:$0xff]   ;;  %v4936_v2 = vld [vmem:[#allocation6 + $0x40c] ss:$16 sps:$4 sm:$0xff]  }
 0x32d   : > { %3077 = vmatpush1.bf16.msra.mxu1 %v4847_v3  ;;  %3241 = vmatpush1.bf16.msra.mxu0 %v4850_v4  ;;  %v1448_v3 = vrot.slane %v5705_v51, %v1447_v61  ;;  %v4931_v4 = vld [vmem:[#allocation6 + $0x400] ss:$16 sps:$4 sm:$0xff]   ;;  %v5006_v61 = vld [vmem:[#allocation6 + $0x588] ss:$16 sps:$4 sm:$0xff]  }
 0x32e   : > { %3078 = vmatprep.subr.bf16.mxu1 %v4855_v5  ;;  %3242 = vmatprep.subr.bf16.mxu0 %v4858_v6  ;;  %v1467_v5 = vpack.c.bf16 %v1436_v63, %v1436_v63  ;;  %v4934_v6 = vld [vmem:[#allocation6 + $0x408] ss:$16 sps:$4 sm:$0xff]   ;;  %v5009_v63 = vld [vmem:[#allocation6 + $0x5a0] ss:$16 sps:$4 sm:$0xff]  }
 0x331   : > { %3079 = vmatpush1.bf16.msra.mxu1 %v4853_v7  ;;  %3243 = vmatpush1.bf16.msra.mxu0 %v4856_v9  ;;  %v1470_v7 = vpack.c.bf16 %v1448_v3, %v1448_v3  ;;  %v4939_v9 = vld [vmem:[#allocation6 + $0x424] ss:$16 sps:$4 sm:$0xff]   ;;  %v5020_v3 = vld [vmem:[#allocation6 + $0x5cc] ss:$16 sps:$4 sm:$0xff]  }
 0x332   : > { %3080 = vmatprep.subr.bf16.mxu1 %v4861_v10  ;;  %3244 = vmatprep.subr.bf16.mxu0 %v4864_v14  ;;  %v4942_v10 = vld [vmem:[#allocation6 + $0x42c] ss:$16 sps:$4 sm:$0xff]   ;;  %v4937_v14 = vld [vmem:[#allocation6 + $0x420] ss:$16 sps:$4 sm:$0xff]  }
 0x335   : > { %3081 = vmatpush1.bf16.msra.mxu1 %v4859_v15  ;;  %3245 = vmatpush1.bf16.msra.mxu0 %v4862_v16  ;;  %v4940_v15 = vld [vmem:[#allocation6 + $0x428] ss:$16 sps:$4 sm:$0xff]   ;;  %v4945_v16 = vld [vmem:[#allocation6 + $0x444] ss:$16 sps:$4 sm:$0xff]  }
 0x336   : > { %3082 = vmatprep.subr.bf16.mxu1 %v4867_v17  ;;  %3246 = vmatprep.subr.bf16.mxu0 %v4870_v18  ;;  %v4948_v17 = vld [vmem:[#allocation6 + $0x44c] ss:$16 sps:$4 sm:$0xff]   ;;  %v4943_v18 = vld [vmem:[#allocation6 + $0x440] ss:$16 sps:$4 sm:$0xff]  }
 0x339   : > { %3083 = vmatpush1.bf16.msra.mxu1 %v4865_v19  ;;  %3247 = vmatpush1.bf16.msra.mxu0 %v4868_v20  ;;  %v4946_v19 = vld [vmem:[#allocation6 + $0x448] ss:$16 sps:$4 sm:$0xff]   ;;  %v4951_v20 = vld [vmem:[#allocation6 + $0x464] ss:$16 sps:$4 sm:$0xff]  }
 0x33a   : > { %3084 = vmatprep.subr.bf16.mxu1 %v4873_v21  ;;  %3248 = vmatprep.subr.bf16.mxu0 %v4876_v22  ;;  %v4954_v21 = vld [vmem:[#allocation6 + $0x46c] ss:$16 sps:$4 sm:$0xff]   ;;  %v4949_v22 = vld [vmem:[#allocation6 + $0x460] ss:$16 sps:$4 sm:$0xff]  }
 0x33d   : > { %3085 = vmatpush1.bf16.msra.mxu1 %v4871_v8  ;;  %3249 = vmatpush1.bf16.msra.mxu0 %v4874_v23  ;;  %v4952_v8 = vld [vmem:[#allocation6 + $0x468] ss:$16 sps:$4 sm:$0xff]   ;;  %v4957_v23 = vld [vmem:[#allocation6 + $0x484] ss:$16 sps:$4 sm:$0xff]  }
 0x33e   : > { %3086 = vmatprep.subr.bf16.mxu1 %v4879_v24  ;;  %3250 = vmatprep.subr.bf16.mxu0 %v4882_v25  ;;  %v4960_v24 = vld [vmem:[#allocation6 + $0x48c] ss:$16 sps:$4 sm:$0xff]   ;;  %v4955_v25 = vld [vmem:[#allocation6 + $0x480] ss:$16 sps:$4 sm:$0xff]  }
 0x341   : > { %3087 = vmatpush1.bf16.msra.mxu1 %v4877_v26  ;;  %3251 = vmatpush1.bf16.msra.mxu0 %v4880_v27  ;;  %v4958_v26 = vld [vmem:[#allocation6 + $0x488] ss:$16 sps:$4 sm:$0xff]   ;;  %v4963_v27 = vld [vmem:[#allocation6 + $0x4a4] ss:$16 sps:$4 sm:$0xff]  }
 0x342   : > { %3088 = vmatprep.subr.bf16.mxu1 %v4885_v28  ;;  %3252 = vmatprep.subr.bf16.mxu0 %v4888_v29  ;;  %v4966_v28 = vld [vmem:[#allocation6 + $0x4ac] ss:$16 sps:$4 sm:$0xff]   ;;  %v4961_v29 = vld [vmem:[#allocation6 + $0x4a0] ss:$16 sps:$4 sm:$0xff]  }
 0x345   : > { %3089 = vmatpush1.bf16.msra.mxu1 %v4883_v30  ;;  %3253 = vmatpush1.bf16.msra.mxu0 %v4886_v31  ;;  %v4964_v30 = vld [vmem:[#allocation6 + $0x4a8] ss:$16 sps:$4 sm:$0xff]   ;;  %v4969_v31 = vld [vmem:[#allocation6 + $0x4c4] ss:$16 sps:$4 sm:$0xff]  }
 0x346   : > { %3090 = vmatprep.subr.bf16.mxu1 %v4891_v32  ;;  %3254 = vmatprep.subr.bf16.mxu0 %v4894_v33  ;;  %v4972_v32 = vld [vmem:[#allocation6 + $0x4cc] ss:$16 sps:$4 sm:$0xff]   ;;  %v4967_v33 = vld [vmem:[#allocation6 + $0x4c0] ss:$16 sps:$4 sm:$0xff]  }
 0x349   : > { %3091 = vmatpush1.bf16.msra.mxu1 %v4889_v11  ;;  %3255 = vmatpush1.bf16.msra.mxu0 %v4892_v12  ;;  %v4970_v11 = vld [vmem:[#allocation6 + $0x4c8] ss:$16 sps:$4 sm:$0xff]   ;;  %v4975_v12 = vld [vmem:[#allocation6 + $0x4e4] ss:$16 sps:$4 sm:$0xff]  }
 0x34a   : > { %3092 = vmatprep.subr.bf16.mxu1 %v4897_v13  ;;  %3256 = vmatprep.subr.bf16.mxu0 %v4900_v34  ;;  %v4978_v13 = vld [vmem:[#allocation6 + $0x4ec] ss:$16 sps:$4 sm:$0xff]   ;;  %v4973_v34 = vld [vmem:[#allocation6 + $0x4e0] ss:$16 sps:$4 sm:$0xff]  }
 0x34d   : > { %3093 = vmatpush1.bf16.msra.mxu1 %v4895_v35  ;;  %3257 = vmatpush1.bf16.msra.mxu0 %v4898_v36  ;;  %v4976_v35 = vld [vmem:[#allocation6 + $0x4e8] ss:$16 sps:$4 sm:$0xff]   ;;  %v4981_v36 = vld [vmem:[#allocation6 + $0x504] ss:$16 sps:$4 sm:$0xff]  }
 0x34e   : > { %3094 = vmatprep.subr.bf16.mxu1 %v4903_v37  ;;  %3258 = vmatprep.subr.bf16.mxu0 %v4906_v38  ;;  %v4984_v37 = vld [vmem:[#allocation6 + $0x50c] ss:$16 sps:$4 sm:$0xff]   ;;  %v4979_v38 = vld [vmem:[#allocation6 + $0x500] ss:$16 sps:$4 sm:$0xff]  }
 0x351   : > { %3095 = vmatpush1.bf16.msra.mxu1 %v4901_v39  ;;  %3259 = vmatpush1.bf16.msra.mxu0 %v4904_v42  ;;  %v4982_v39 = vld [vmem:[#allocation6 + $0x508] ss:$16 sps:$4 sm:$0xff]   ;;  %v4987_v42 = vld [vmem:[#allocation6 + $0x524] ss:$16 sps:$4 sm:$0xff]  }
 0x352   : > { %3096 = vmatprep.subr.bf16.mxu1 %v4909_v43  ;;  %3260 = vmatprep.subr.bf16.mxu0 %v4912_v44  ;;  %v4990_v43 = vld [vmem:[#allocation6 + $0x52c] ss:$16 sps:$4 sm:$0xff]   ;;  %v4985_v44 = vld [vmem:[#allocation6 + $0x520] ss:$16 sps:$4 sm:$0xff]  }
 0x355   : > { %3097 = vmatpush1.bf16.msra.mxu1 %v4907_v45  ;;  %3261 = vmatpush1.bf16.msra.mxu0 %v4910_v48  ;;  %v4988_v45 = vld [vmem:[#allocation6 + $0x528] ss:$16 sps:$4 sm:$0xff]   ;;  %v4993_v48 = vld [vmem:[#allocation6 + $0x544] ss:$16 sps:$4 sm:$0xff]  }
 0x356   : > { %3098 = vmatprep.subr.bf16.mxu1 %v4915_v49  ;;  %3262 = vmatprep.subr.bf16.mxu0 %v4918_v50  ;;  %v4996_v49 = vld [vmem:[#allocation6 + $0x54c] ss:$16 sps:$4 sm:$0xff]   ;;  %v4991_v50 = vld [vmem:[#allocation6 + $0x540] ss:$16 sps:$4 sm:$0xff]  }
 0x359   : > { %3099 = vmatpush1.bf16.msra.mxu1 %v4913_v52  ;;  %3263 = vmatpush1.bf16.msra.mxu0 %v4916_v54  ;;  %v4994_v52 = vld [vmem:[#allocation6 + $0x548] ss:$16 sps:$4 sm:$0xff]   ;;  %v4999_v54 = vld [vmem:[#allocation6 + $0x564] ss:$16 sps:$4 sm:$0xff]  }
 0x35a   : > { %3100 = vmatprep.subr.bf16.mxu1 %v4921_v55  ;;  %3264 = vmatprep.subr.bf16.mxu0 %v4924_v56  ;;  %v5002_v55 = vld [vmem:[#allocation6 + $0x56c] ss:$16 sps:$4 sm:$0xff]   ;;  %v4997_v56 = vld [vmem:[#allocation6 + $0x560] ss:$16 sps:$4 sm:$0xff]  }
 0x35d   : > { %3101 = vmatpush1.bf16.msra.mxu1 %v4919_v57  ;;  %3265 = vmatpush1.bf16.msra.mxu0 %v4922_v58  ;;  %v5000_v57 = vld [vmem:[#allocation6 + $0x568] ss:$16 sps:$4 sm:$0xff]   ;;  %v5005_v58 = vld [vmem:[#allocation6 + $0x584] ss:$16 sps:$4 sm:$0xff]  }
 0x35e   : > { %3102 = vmatprep.subr.bf16.mxu1 %v4927_v59  ;;  %3266 = vmatprep.subr.bf16.mxu0 %v4930_v60  ;;  %v5008_v59 = vld [vmem:[#allocation6 + $0x58c] ss:$16 sps:$4 sm:$0xff]   ;;  %v5003_v60 = vld [vmem:[#allocation6 + $0x580] ss:$16 sps:$4 sm:$0xff]  }
 0x361   : > { %3103 = vmatpush1.bf16.msra.mxu1 %v4925_v1  ;;  %3267 = vmatpush1.bf16.msra.mxu0 %v4928_v62  ;;  %v5011_v1 = vld [vmem:[#allocation6 + $0x5a4] ss:$16 sps:$4 sm:$0xff]   ;;  %v5014_v62 = vld [vmem:[#allocation6 + $0x5ac] ss:$16 sps:$4 sm:$0xff]  }
 0x362   : > { %3113 = vmatprep.subr.bf16.mxu1 %v4933_v0  ;;  %3277 = vmatprep.subr.bf16.mxu0 %v4936_v2  ;;  %v5012_v0 = vld [vmem:[#allocation6 + $0x5a8] ss:$16 sps:$4 sm:$0xff]   ;;  %v5017_v2 = vld [vmem:[#allocation6 + $0x5c4] ss:$16 sps:$4 sm:$0xff]  }
 0x364   : > { %3105 = vmatmul.mubr.bf16.vlgmr.msra.gmra.mrb[4].mxu1 %v1467_v5  ;;  %3269 = vmatmul.mubr.bf16.vlgmr.msra.gmra.mrb[16].mxu0 %v1467_v5  ;;  %v5018_v5 = vld [vmem:[#allocation6 + $0x5c8] ss:$16 sps:$4 sm:$0xff]  }
 0x365   : > { %3114 = vmatpush1.bf16.msra.mxu1 %v4931_v4  ;;  %3145 = vmatprep.mubr.bf16.mxu1 %v1470_v7  ;;  %v5015_v4 = vld [vmem:[#allocation6 + $0x5c0] ss:$16 sps:$4 sm:$0xff]  }
 0x366   : > { %3278 = vmatpush1.bf16.msra.mxu0 %v4934_v6  ;;  %3309 = vmatprep.mubr.bf16.mxu0 %v1470_v7  ;;  %v5023_v6 = vld [vmem:[#allocation6 + $0x5e4] ss:$16 sps:$4 sm:$0xff]   ;;  %v1443_v7 = vsub.s32 4, %v5662_v40 }
 0x367   : > { %3115 = vmatprep.subr.bf16.mxu1 %v4939_v9  ;;  %3279 = vmatprep.subr.bf16.mxu0 %v4942_v10  ;;  %v5026_v9 = vld [vmem:[#allocation6 + $0x5ec] ss:$16 sps:$4 sm:$0xff]   ;;  %v1455_v10 = vsub.s32 7, %v5662_v40 }
 0x369   : > { %3116 = vmatpush1.bf16.msra.mxu1 %v4937_v14  ;;  %v5021_v14 = vld [vmem:[#allocation6 + $0x5e0] ss:$16 sps:$4 sm:$0xff]  }
 0x36a   : > { %3280 = vmatpush1.bf16.msra.mxu0 %v4940_v15  ;;  %3117 = vmatprep.subr.bf16.mxu1 %v4945_v16  ;;  %v5024_v15 = vld [vmem:[#allocation6 + $0x5e8] ss:$16 sps:$4 sm:$0xff]   ;;  %v1444_v16 = vrot.slane %v5705_v51, %v1443_v7  ;;  %v5104_v7 = vld [vmem:[#allocation6 + $0x78c] ss:$16 sps:$4 sm:$0xff]  }
 0x36b   : > { %3281 = vmatprep.subr.bf16.mxu0 %v4948_v17  ;;  %v5029_v17 = vld [vmem:[#allocation6 + $0x604] ss:$16 sps:$4 sm:$0xff]  }
 0x36d   : > { %3118 = vmatpush1.bf16.msra.mxu1 %v4943_v18  ;;  %v5032_v18 = vld [vmem:[#allocation6 + $0x60c] ss:$16 sps:$4 sm:$0xff]  }
 0x36e   : > { %3282 = vmatpush1.bf16.msra.mxu0 %v4946_v19  ;;  %3119 = vmatprep.subr.bf16.mxu1 %v4951_v20  ;;  %v1456_v19 = vrot.slane %v5705_v51, %v1455_v10  ;;  %v5027_v20 = vld [vmem:[#allocation6 + $0x600] ss:$16 sps:$4 sm:$0xff]   ;;  %v5102_v10 = vld [vmem:[#allocation6 + $0x788] ss:$16 sps:$4 sm:$0xff]  }
 0x36f   : > { %3283 = vmatprep.subr.bf16.mxu0 %v4954_v21  ;;  %v1469_v21 = vpack.c.bf16 %v1444_v16, %v1444_v16  ;;  %v5105_v16 = vld [vmem:[#allocation6 + $0x7a0] ss:$16 sps:$4 sm:$0xff]  }
 0x371   : > { %3120 = vmatpush1.bf16.msra.mxu1 %v4949_v22  ;;  %v5030_v22 = vld [vmem:[#allocation6 + $0x608] ss:$16 sps:$4 sm:$0xff]  }
 0x372   : > { %3284 = vmatpush1.bf16.msra.mxu0 %v4952_v8  ;;  %3121 = vmatprep.subr.bf16.mxu1 %v4957_v23  ;;  %v5035_v8 = vld [vmem:[#allocation6 + $0x624] ss:$16 sps:$4 sm:$0xff]   ;;  %v1472_v23 = vpack.c.bf16 %v1456_v19, %v1456_v19  ;;  %v5116_v19 = vld [vmem:[#allocation6 + $0x7cc] ss:$16 sps:$4 sm:$0xff]  }
 0x373   : > { %3285 = vmatprep.subr.bf16.mxu0 %v4960_v24  ;;  %v5038_v24 = vld [vmem:[#allocation6 + $0x62c] ss:$16 sps:$4 sm:$0xff]  }
 0x375   : > { %3122 = vmatpush1.bf16.msra.mxu1 %v4955_v25  ;;  %v5033_v25 = vld [vmem:[#allocation6 + $0x620] ss:$16 sps:$4 sm:$0xff]  }
 0x376   : > { %3286 = vmatpush1.bf16.msra.mxu0 %v4958_v26  ;;  %3123 = vmatprep.subr.bf16.mxu1 %v4963_v27  ;;  %v5036_v26 = vld [vmem:[#allocation6 + $0x628] ss:$16 sps:$4 sm:$0xff]   ;;  %v5041_v27 = vld [vmem:[#allocation6 + $0x644] ss:$16 sps:$4 sm:$0xff]  }
 0x377   : > { %3287 = vmatprep.subr.bf16.mxu0 %v4966_v28  ;;  %v5044_v28 = vld [vmem:[#allocation6 + $0x64c] ss:$16 sps:$4 sm:$0xff]  }
 0x379   : > { %3124 = vmatpush1.bf16.msra.mxu1 %v4961_v29  ;;  %v5039_v29 = vld [vmem:[#allocation6 + $0x640] ss:$16 sps:$4 sm:$0xff]  }
 0x37a   : > { %3288 = vmatpush1.bf16.msra.mxu0 %v4964_v30  ;;  %3125 = vmatprep.subr.bf16.mxu1 %v4969_v31  ;;  %v5042_v30 = vld [vmem:[#allocation6 + $0x648] ss:$16 sps:$4 sm:$0xff]   ;;  %v5047_v31 = vld [vmem:[#allocation6 + $0x664] ss:$16 sps:$4 sm:$0xff]  }
 0x37b   : > { %3289 = vmatprep.subr.bf16.mxu0 %v4972_v32  ;;  %v5050_v32 = vld [vmem:[#allocation6 + $0x66c] ss:$16 sps:$4 sm:$0xff]  }
 0x37d   : > { %3126 = vmatpush1.bf16.msra.mxu1 %v4967_v33  ;;  %v5045_v33 = vld [vmem:[#allocation6 + $0x660] ss:$16 sps:$4 sm:$0xff]  }
 0x37e   : > { %3290 = vmatpush1.bf16.msra.mxu0 %v4970_v11  ;;  %3127 = vmatprep.subr.bf16.mxu1 %v4975_v12  ;;  %v5048_v11 = vld [vmem:[#allocation6 + $0x668] ss:$16 sps:$4 sm:$0xff]   ;;  %v5053_v12 = vld [vmem:[#allocation6 + $0x684] ss:$16 sps:$4 sm:$0xff]  }
 0x37f   : > { %3291 = vmatprep.subr.bf16.mxu0 %v4978_v13  ;;  %v5056_v13 = vld [vmem:[#allocation6 + $0x68c] ss:$16 sps:$4 sm:$0xff]  }
 0x381   : > { %3128 = vmatpush1.bf16.msra.mxu1 %v4973_v34  ;;  %v5051_v34 = vld [vmem:[#allocation6 + $0x680] ss:$16 sps:$4 sm:$0xff]  }
 0x382   : > { %3292 = vmatpush1.bf16.msra.mxu0 %v4976_v35  ;;  %3129 = vmatprep.subr.bf16.mxu1 %v4981_v36  ;;  %v5054_v35 = vld [vmem:[#allocation6 + $0x688] ss:$16 sps:$4 sm:$0xff]   ;;  %v5059_v36 = vld [vmem:[#allocation6 + $0x6a4] ss:$16 sps:$4 sm:$0xff]  }
 0x383   : > { %3293 = vmatprep.subr.bf16.mxu0 %v4984_v37  ;;  %v5062_v37 = vld [vmem:[#allocation6 + $0x6ac] ss:$16 sps:$4 sm:$0xff]  }
 0x385   : > { %3130 = vmatpush1.bf16.msra.mxu1 %v4979_v38  ;;  %v5057_v38 = vld [vmem:[#allocation6 + $0x6a0] ss:$16 sps:$4 sm:$0xff]  }
 0x386   : > { %3294 = vmatpush1.bf16.msra.mxu0 %v4982_v39  ;;  %3131 = vmatprep.subr.bf16.mxu1 %v4987_v42  ;;  %v5060_v39 = vld [vmem:[#allocation6 + $0x6a8] ss:$16 sps:$4 sm:$0xff]   ;;  %v5065_v42 = vld [vmem:[#allocation6 + $0x6c4] ss:$16 sps:$4 sm:$0xff]  }
 0x387   : > { %3295 = vmatprep.subr.bf16.mxu0 %v4990_v43  ;;  %v5068_v43 = vld [vmem:[#allocation6 + $0x6cc] ss:$16 sps:$4 sm:$0xff]  }
 0x389   : > { %3132 = vmatpush1.bf16.msra.mxu1 %v4985_v44  ;;  %v5063_v44 = vld [vmem:[#allocation6 + $0x6c0] ss:$16 sps:$4 sm:$0xff]  }
 0x38a   : > { %3296 = vmatpush1.bf16.msra.mxu0 %v4988_v45  ;;  %3133 = vmatprep.subr.bf16.mxu1 %v4993_v48  ;;  %v5066_v45 = vld [vmem:[#allocation6 + $0x6c8] ss:$16 sps:$4 sm:$0xff]   ;;  %v5071_v48 = vld [vmem:[#allocation6 + $0x6e4] ss:$16 sps:$4 sm:$0xff]  }
 0x38b   : > { %3297 = vmatprep.subr.bf16.mxu0 %v4996_v49  ;;  %v5074_v49 = vld [vmem:[#allocation6 + $0x6ec] ss:$16 sps:$4 sm:$0xff]  }
 0x38d   : > { %3134 = vmatpush1.bf16.msra.mxu1 %v4991_v50  ;;  %v5069_v50 = vld [vmem:[#allocation6 + $0x6e0] ss:$16 sps:$4 sm:$0xff]  }
 0x38e   : > { %3298 = vmatpush1.bf16.msra.mxu0 %v4994_v52  ;;  %3135 = vmatprep.subr.bf16.mxu1 %v4999_v54  ;;  %v5072_v52 = vld [vmem:[#allocation6 + $0x6e8] ss:$16 sps:$4 sm:$0xff]   ;;  %v5077_v54 = vld [vmem:[#allocation6 + $0x704] ss:$16 sps:$4 sm:$0xff]  }
 0x38f   : > { %3299 = vmatprep.subr.bf16.mxu0 %v5002_v55  ;;  %v5080_v55 = vld [vmem:[#allocation6 + $0x70c] ss:$16 sps:$4 sm:$0xff]  }
 0x391   : > { %3136 = vmatpush1.bf16.msra.mxu1 %v4997_v56  ;;  %v5075_v56 = vld [vmem:[#allocation6 + $0x700] ss:$16 sps:$4 sm:$0xff]  }
 0x392   : > { %3300 = vmatpush1.bf16.msra.mxu0 %v5000_v57  ;;  %3137 = vmatprep.subr.bf16.mxu1 %v5005_v58  ;;  %v5078_v57 = vld [vmem:[#allocation6 + $0x708] ss:$16 sps:$4 sm:$0xff]   ;;  %v5083_v58 = vld [vmem:[#allocation6 + $0x724] ss:$16 sps:$4 sm:$0xff]  }
 0x393   : > { %3301 = vmatprep.subr.bf16.mxu0 %v5008_v59  ;;  %v5086_v59 = vld [vmem:[#allocation6 + $0x72c] ss:$16 sps:$4 sm:$0xff]  }
 0x395   : > { %3138 = vmatpush1.bf16.msra.mxu1 %v5003_v60  ;;  %v5081_v60 = vld [vmem:[#allocation6 + $0x720] ss:$16 sps:$4 sm:$0xff]  }
 0x396   : > { %3302 = vmatpush1.bf16.msra.mxu0 %v5006_v61  ;;  %3139 = vmatprep.subr.bf16.mxu1 %v5011_v1  ;;  %v5084_v61 = vld [vmem:[#allocation6 + $0x728] ss:$16 sps:$4 sm:$0xff]   ;;  %v5089_v1 = vld [vmem:[#allocation6 + $0x744] ss:$16 sps:$4 sm:$0xff]  }
 0x397   : > { %3303 = vmatprep.subr.bf16.mxu0 %v5014_v62  ;;  %v5092_v62 = vld [vmem:[#allocation6 + $0x74c] ss:$16 sps:$4 sm:$0xff]  }
 0x399   : > { %3140 = vmatpush1.bf16.msra.mxu1 %v5009_v63  ;;  %v5087_v63 = vld [vmem:[#allocation6 + $0x740] ss:$16 sps:$4 sm:$0xff]  }
 0x39a   : > { %3304 = vmatpush1.bf16.msra.mxu0 %v5012_v0  ;;  %3141 = vmatprep.subr.bf16.mxu1 %v5017_v2  ;;  %v5090_v0 = vld [vmem:[#allocation6 + $0x748] ss:$16 sps:$4 sm:$0xff]   ;;  %v5095_v2 = vld [vmem:[#allocation6 + $0x764] ss:$16 sps:$4 sm:$0xff]  }
 0x39b   : > { %3305 = vmatprep.subr.bf16.mxu0 %v5020_v3  ;;  %v5098_v3 = vld [vmem:[#allocation6 + $0x76c] ss:$16 sps:$4 sm:$0xff]  }
 0x39d   : > { %3142 = vmatpush1.bf16.msra.mxu1 %v5015_v4  ;;  %v5093_v4 = vld [vmem:[#allocation6 + $0x760] ss:$16 sps:$4 sm:$0xff]  }
 0x39e   : > { %3306 = vmatpush1.bf16.msra.mxu0 %v5018_v5  ;;  %3143 = vmatprep.subr.bf16.mxu1 %v5023_v6  ;;  %v5096_v5 = vld [vmem:[#allocation6 + $0x768] ss:$16 sps:$4 sm:$0xff]   ;;  %v5101_v6 = vld [vmem:[#allocation6 + $0x784] ss:$16 sps:$4 sm:$0xff]  }
 0x39f   : > { %3307 = vmatprep.subr.bf16.mxu0 %v5026_v9  ;;  %v5099_v9 = vld [vmem:[#allocation6 + $0x780] ss:$16 sps:$4 sm:$0xff]  }
 0x3a1   : > { %3144 = vmatpush1.bf16.msra.mxu1 %v5021_v14  ;;  %v5107_v14 = vld [vmem:[#allocation6 + $0x7a4] ss:$16 sps:$4 sm:$0xff]  }
 0x3a2   : > { %3308 = vmatpush1.bf16.msra.mxu0 %v5024_v15  ;;  %3154 = vmatprep.subr.bf16.mxu1 %v5029_v17  ;;  %v5110_v15 = vld [vmem:[#allocation6 + $0x7ac] ss:$16 sps:$4 sm:$0xff]   ;;  %v5108_v17 = vld [vmem:[#allocation6 + $0x7a8] ss:$16 sps:$4 sm:$0xff]  }
 0x3a3   : > { %3318 = vmatprep.subr.bf16.mxu0 %v5032_v18  ;;  %v5113_v18 = vld [vmem:[#allocation6 + $0x7c4] ss:$16 sps:$4 sm:$0xff]  }
 0x3a4   : > { %3146 = vmatmul.mubr.bf16.vlgmr.msra.gmra.mrb[4].mxu1 %v1469_v21 }
 0x3a5   : > { %3310 = vmatmul.mubr.bf16.vlgmr.msra.gmra.mrb[16].mxu0 %v1469_v21  ;;  %3155 = vmatpush1.bf16.msra.mxu1 %v5027_v20  ;;  %v5111_v20 = vld [vmem:[#allocation6 + $0x7c0] ss:$16 sps:$4 sm:$0xff]   ;;  %v5114_v21 = vld [vmem:[#allocation6 + $0x7c8] ss:$16 sps:$4 sm:$0xff]  }
 0x3a6   : > { %3186 = vmatprep.mubr.bf16.mxu1 %v1472_v23  ;;  %3319 = vmatpush1.bf16.msra.mxu0 %v5030_v22  ;;  %v5119_v22 = vld [vmem:[#allocation6 + $0x7e4] ss:$16 sps:$4 sm:$0xff]  }
 0x3a7   : > { %3350 = vmatprep.mubr.bf16.mxu0 %v1472_v23  ;;  %3156 = vmatprep.subr.bf16.mxu1 %v5035_v8  ;;  %v1451_v8 = vsub.s32 6, %v5662_v40  ;;  %v5122_v23 = vld [vmem:[#allocation6 + $0x7ec] ss:$16 sps:$4 sm:$0xff]   ;;  %v5126_v40 = vld [vmem:[#allocation8 + $0x10] ss:$8 sps:$4 sm:$0xff]  }
 0x3a8   : > { %3320 = vmatprep.subr.bf16.mxu0 %v5038_v24  ;;  %v5117_v24 = vld [vmem:[#allocation6 + $0x7e0] ss:$16 sps:$4 sm:$0xff]  }
 0x3a9   : > { %3157 = vmatpush1.bf16.msra.mxu1 %v5033_v25  ;;  %v5120_v25 = vld [vmem:[#allocation6 + $0x7e8] ss:$16 sps:$4 sm:$0xff]  }
 0x3aa   : > { %3321 = vmatpush1.bf16.msra.mxu0 %v5036_v26  ;;  %3158 = vmatprep.subr.bf16.mxu1 %v5041_v27  ;;  %v1452_v26 = vrot.slane %v5705_v51, %v1451_v8  ;;  %v5125_v27 = vld [vmem:[#allocation8 + $0x4] ss:$8 sps:$4 sm:$0xff]   ;;  %v5132_v51 = vld [vmem:[#allocation8 + $0x30] ss:$8 sps:$4 sm:$0xff]  }
 0x3ab   : > { %3322 = vmatprep.subr.bf16.mxu0 %v5044_v28  ;;  %v5123_v28 = vld [vmem:[#allocation8] ss:$8 sps:$4 sm:$0xff]  }
 0x3ad   : > { %3159 = vmatpush1.bf16.msra.mxu1 %v5039_v29  ;;  %v1471_v29 = vpack.c.bf16 %v1452_v26, %v1452_v26 }
 0x3ae   : > { %3323 = vmatpush1.bf16.msra.mxu0 %v5042_v30  ;;  %3160 = vmatprep.subr.bf16.mxu1 %v5047_v31  ;;  %v5128_v30 = vld [vmem:[#allocation8 + $0x14] ss:$8 sps:$4 sm:$0xff]   ;;  %v5131_v31 = vld [vmem:[#allocation8 + $0x24] ss:$8 sps:$4 sm:$0xff]  }
 0x3af   : > { %3324 = vmatprep.subr.bf16.mxu0 %v5050_v32  ;;  %v5129_v32 = vld [vmem:[#allocation8 + $0x20] ss:$8 sps:$4 sm:$0xff]  }
 0x3b1   : > { %3161 = vmatpush1.bf16.msra.mxu1 %v5045_v33  ;;  %v5134_v33 = vld [vmem:[#allocation8 + $0x34] ss:$8 sps:$4 sm:$0xff]  }
 0x3b2   : > { %3325 = vmatpush1.bf16.msra.mxu0 %v5048_v11  ;;  %3162 = vmatprep.subr.bf16.mxu1 %v5053_v12  ;;  %v5137_v11 = vld [vmem:[#allocation8 + $0x44] ss:$8 sps:$4 sm:$0xff]   ;;  %v5135_v12 = vld [vmem:[#allocation8 + $0x40] ss:$8 sps:$4 sm:$0xff]  }
 0x3b3   : > { %3326 = vmatprep.subr.bf16.mxu0 %v5056_v13  ;;  %v5140_v13 = vld [vmem:[#allocation8 + $0x54] ss:$8 sps:$4 sm:$0xff]  }
 0x3b5   : > { %3163 = vmatpush1.bf16.msra.mxu1 %v5051_v34  ;;  %v5138_v34 = vld [vmem:[#allocation8 + $0x50] ss:$8 sps:$4 sm:$0xff]  }
 0x3b6   : > { %3327 = vmatpush1.bf16.msra.mxu0 %v5054_v35  ;;  %3164 = vmatprep.subr.bf16.mxu1 %v5059_v36  ;;  %v5143_v35 = vld [vmem:[#allocation8 + $0x64] ss:$8 sps:$4 sm:$0xff]   ;;  %v5141_v36 = vld [vmem:[#allocation8 + $0x60] ss:$8 sps:$4 sm:$0xff]  }
 0x3b7   : > { %3328 = vmatprep.subr.bf16.mxu0 %v5062_v37  ;;  %v5146_v37 = vld [vmem:[#allocation8 + $0x74] ss:$8 sps:$4 sm:$0xff]  }
 0x3b9   : > { %3165 = vmatpush1.bf16.msra.mxu1 %v5057_v38  ;;  %v5144_v38 = vld [vmem:[#allocation8 + $0x70] ss:$8 sps:$4 sm:$0xff]  }
 0x3ba   : > { %3329 = vmatpush1.bf16.msra.mxu0 %v5060_v39  ;;  %3166 = vmatprep.subr.bf16.mxu1 %v5065_v42  ;;  %v5149_v39 = vld [vmem:[#allocation8 + $0x84] ss:$8 sps:$4 sm:$0xff]   ;;  %v5147_v42 = vld [vmem:[#allocation8 + $0x80] ss:$8 sps:$4 sm:$0xff]  }
 0x3bb   : > { %3330 = vmatprep.subr.bf16.mxu0 %v5068_v43  ;;  %v5152_v43 = vld [vmem:[#allocation8 + $0x94] ss:$8 sps:$4 sm:$0xff]  }
 0x3bd   : > { %3167 = vmatpush1.bf16.msra.mxu1 %v5063_v44  ;;  %v5150_v44 = vld [vmem:[#allocation8 + $0x90] ss:$8 sps:$4 sm:$0xff]  }
 0x3be   : > { %3331 = vmatpush1.bf16.msra.mxu0 %v5066_v45  ;;  %3168 = vmatprep.subr.bf16.mxu1 %v5071_v48  ;;  %v5155_v45 = vld [vmem:[#allocation8 + $0xa4] ss:$8 sps:$4 sm:$0xff]   ;;  %v5153_v48 = vld [vmem:[#allocation8 + $0xa0] ss:$8 sps:$4 sm:$0xff]  }
 0x3bf   : > { %3332 = vmatprep.subr.bf16.mxu0 %v5074_v49  ;;  %v5158_v49 = vld [vmem:[#allocation8 + $0xb4] ss:$8 sps:$4 sm:$0xff]  }
 0x3c1   : > { %3169 = vmatpush1.bf16.msra.mxu1 %v5069_v50  ;;  %v5156_v50 = vld [vmem:[#allocation8 + $0xb0] ss:$8 sps:$4 sm:$0xff]  }
 0x3c2   : > { %3333 = vmatpush1.bf16.msra.mxu0 %v5072_v52  ;;  %3170 = vmatprep.subr.bf16.mxu1 %v5077_v54  ;;  %v5161_v52 = vld [vmem:[#allocation8 + $0xc4] ss:$8 sps:$4 sm:$0xff]   ;;  %v5159_v54 = vld [vmem:[#allocation8 + $0xc0] ss:$8 sps:$4 sm:$0xff]  }
 0x3c3   : > { %3334 = vmatprep.subr.bf16.mxu0 %v5080_v55  ;;  %v5164_v55 = vld [vmem:[#allocation8 + $0xd4] ss:$8 sps:$4 sm:$0xff]  }
 0x3c5   : > { %3171 = vmatpush1.bf16.msra.mxu1 %v5075_v56  ;;  %v5162_v56 = vld [vmem:[#allocation8 + $0xd0] ss:$8 sps:$4 sm:$0xff]  }
 0x3c6   : > { %3335 = vmatpush1.bf16.msra.mxu0 %v5078_v57  ;;  %3172 = vmatprep.subr.bf16.mxu1 %v5083_v58  ;;  %v5167_v57 = vld [vmem:[#allocation8 + $0xe4] ss:$8 sps:$4 sm:$0xff]   ;;  %v5165_v58 = vld [vmem:[#allocation8 + $0xe0] ss:$8 sps:$4 sm:$0xff]  }
 0x3c7   : > { %3336 = vmatprep.subr.bf16.mxu0 %v5086_v59  ;;  %v5170_v59 = vld [vmem:[#allocation8 + $0xf4] ss:$8 sps:$4 sm:$0xff]  }
 0x3c9   : > { %3173 = vmatpush1.bf16.msra.mxu1 %v5081_v60  ;;  %v5168_v60 = vld [vmem:[#allocation8 + $0xf0] ss:$8 sps:$4 sm:$0xff]  }
 0x3ca   : > { %3337 = vmatpush1.bf16.msra.mxu0 %v5084_v61  ;;  %3174 = vmatprep.subr.bf16.mxu1 %v5089_v1  ;;  %v5173_v61 = vld [vmem:[#allocation8 + $0x104] ss:$8 sps:$4 sm:$0xff]  }
 0x3cb   : > { %3338 = vmatprep.subr.bf16.mxu0 %v5092_v62  ;;  %v5219_v1 = vld [vmem:[%s5858_s11 + $0x40] sm:$0xff]  }
 0x3cc   : > { %v5220_v62 = vld [vmem:[%s5858_s11] sm:$0xff]  }
 0x3cd   : > { %3175 = vmatpush1.bf16.msra.mxu1 %v5087_v63  ;;  %v5221_v63 = vld [vmem:[%s5858_s11 + $0x48] sm:$0xff]  }
 0x3ce   : > { %3339 = vmatpush1.bf16.msra.mxu0 %v5090_v0  ;;  %3176 = vmatprep.subr.bf16.mxu1 %v5095_v2  ;;  %v5222_v0 = vld [vmem:[%s5858_s11 + $0x8] sm:$0xff]   ;;  %v5223_v2 = vld [vmem:[%s5858_s11 + $0x50] sm:$0xff]  }
 0x3cf   : > { %3340 = vmatprep.subr.bf16.mxu0 %v5098_v3  ;;  %v5224_v3 = vld [vmem:[%s5858_s11 + $0x10] sm:$0xff]  }
 0x3d1   : > { %3177 = vmatpush1.bf16.msra.mxu1 %v5093_v4  ;;  %v5225_v4 = vld [vmem:[%s5858_s11 + $0x58] sm:$0xff]  }
 0x3d2   : > { %3341 = vmatpush1.bf16.msra.mxu0 %v5096_v5  ;;  %3178 = vmatprep.subr.bf16.mxu1 %v5101_v6  ;;  %v5226_v5 = vld [vmem:[%s5858_s11 + $0x18] sm:$0xff]   ;;  %v5227_v6 = vld [vmem:[%s5858_s11 + $0x60] sm:$0xff]  }
 0x3d3   : > { %3342 = vmatprep.subr.bf16.mxu0 %v5104_v7  ;;  %v5228_v7 = vld [vmem:[%s5858_s11 + $0x20] sm:$0xff]  }
 0x3d5   : > { %3179 = vmatpush1.bf16.msra.mxu1 %v5099_v9  ;;  %v5229_v9 = vld [vmem:[%s5858_s11 + $0x68] sm:$0xff]  }
 0x3d6   : > { %3343 = vmatpush1.bf16.msra.mxu0 %v5102_v10  ;;  %3180 = vmatprep.subr.bf16.mxu1 %v5107_v14  ;;  %v5230_v10 = vld [vmem:[%s5858_s11 + $0x28] sm:$0xff]   ;;  %v5762_v14 = vld [vmem:[%s5855_s8] sm:$0xf] }
 0x3d7   : > { %3344 = vmatprep.subr.bf16.mxu0 %v5110_v15  ;;  %v3014_v15 = vrot.slane %v5762_v14, %v5665_v41 }
 0x3d9   : > { %3181 = vmatpush1.bf16.msra.mxu1 %v5105_v16  ;;  %v3018_v16 = vrot.slane %v5762_v14, %v5672_v46 }
 0x3da   : > { %3345 = vmatpush1.bf16.msra.mxu0 %v5108_v17  ;;  %3182 = vmatprep.subr.bf16.mxu1 %v5113_v18  ;;  %v3026_v17 = vrot.slane %v5762_v14, %v5681_v53 }
 0x3db   : > { %3346 = vmatprep.subr.bf16.mxu0 %v5116_v19 }
 0x3dd   : > { %3183 = vmatpush1.bf16.msra.mxu1 %v5111_v20 }
 0x3de   : > { %3347 = vmatpush1.bf16.msra.mxu0 %v5114_v21  ;;  %3184 = vmatprep.subr.bf16.mxu1 %v5119_v22 }
 0x3df   : > { %3348 = vmatprep.subr.bf16.mxu0 %v5122_v23 }
 0x3e1   : > { %3185 = vmatpush1.bf16.msra.mxu1 %v5117_v24 }
 0x3e2   : > { %3349 = vmatpush1.bf16.msra.mxu0 %v5120_v25  ;;  %3763 = vmatprep.subr.bf16.mxu1 %v5125_v27 }
 0x3e3   : > { %4562 = vmatprep.subr.bf16.mxu0 %v5219_v1  ;;  %v5215_v1 = vld [vmem:[#allocation8 + $0x1e4] ss:$8 sps:$4 sm:$0xff]  }
 0x3e4   : > { %3187 = vmatmul.mubr.bf16.vlgmr.msra.gmra.mrb[4].mxu1 %v1471_v29 }
 0x3e5   : > { %3351 = vmatmul.mubr.bf16.vlgmr.msra.gmra.mrb[16].mxu0 %v1471_v29  ;;  %3764 = vmatpush1.bf16.msra.mxu1 %v5123_v28 }
 0x3e6   : > { %3765 = vmatprep.subr.bf16.mxu1 %v5128_v30  ;;  %4563 = vmatpush3.bf16.msra.mxu0 %v5220_v62  ;;  %v5213_v62 = vld [vmem:[#allocation8 + $0x1e0] ss:$8 sps:$4 sm:$0xff]  }
 0x3e7   : > { %4564 = vmatprep.subr.bf16.mxu0 %v5221_v63 }
 0x3e9   : > { %3766 = vmatpush1.bf16.msra.mxu1 %v5126_v40 }
 0x3ea   : > { %3767 = vmatprep.subr.bf16.mxu1 %v5131_v31  ;;  %4565 = vmatpush3.bf16.msra.mxu0 %v5222_v0  ;;  %v5171_v31 = vld [vmem:[#allocation8 + $0x100] ss:$8 sps:$4 sm:$0xff]   ;;  %v5218_v0 = vld [vmem:[#allocation8 + $0x1f4] ss:$8 sps:$4 sm:$0xff]  }
 0x3eb   : > { %4566 = vmatprep.subr.bf16.mxu0 %v5223_v2  ;;  %v5216_v2 = vld [vmem:[#allocation8 + $0x1f0] ss:$8 sps:$4 sm:$0xff]  }
 0x3ed   : > { %3768 = vmatpush1.bf16.msra.mxu1 %v5129_v32 }
 0x3ee   : > { %3769 = vmatprep.subr.bf16.mxu1 %v5134_v33  ;;  %4567 = vmatpush3.bf16.msra.mxu0 %v5224_v3  ;;  %v5176_v33 = vld [vmem:[#allocation8 + $0x114] ss:$8 sps:$4 sm:$0xff]  }
 0x3ef   : > { %4568 = vmatprep.subr.bf16.mxu0 %v5225_v4 }
 0x3f1   : > { %3770 = vmatpush1.bf16.msra.mxu1 %v5132_v51  ;;  %v5174_v51 = vld [vmem:[#allocation8 + $0x110] ss:$8 sps:$4 sm:$0xff]  }
 0x3f2   : > { %3771 = vmatprep.subr.bf16.mxu1 %v5137_v11  ;;  %4569 = vmatpush3.bf16.msra.mxu0 %v5226_v5  ;;  %v5179_v11 = vld [vmem:[#allocation8 + $0x124] ss:$8 sps:$4 sm:$0xff]   ;;  %v5231_v5 = vld [vmem:[%s5858_s11 + $0x70] sm:$0xff]  }
 0x3f3   : > { %4570 = vmatprep.subr.bf16.mxu0 %v5227_v6  ;;  %v5233_v6 = vld [vmem:[%s5858_s11 + $0x78] sm:$0xff]  }
 0x3f5   : > { %3772 = vmatpush1.bf16.msra.mxu1 %v5135_v12  ;;  %v5177_v12 = vld [vmem:[#allocation8 + $0x120] ss:$8 sps:$4 sm:$0xff]  }
 0x3f6   : > { %3773 = vmatprep.subr.bf16.mxu1 %v5140_v13  ;;  %4571 = vmatpush3.bf16.msra.mxu0 %v5228_v7  ;;  %v5182_v13 = vld [vmem:[#allocation8 + $0x134] ss:$8 sps:$4 sm:$0xff]  }
 0x3f7   : > { %4572 = vmatprep.subr.bf16.mxu0 %v5229_v9  ;;  %v5234_v7 = vld [vmem:[%s5858_s11 + $0x38] sm:$0xff]   ;;  %v3431_v9 = vld [vmem:[%s5857_s10] sm:$0x3] }
 0x3f9   : > { %3774 = vmatpush1.bf16.msra.mxu1 %v5138_v34  ;;  %v5180_v34 = vld [vmem:[#allocation8 + $0x130] ss:$8 sps:$4 sm:$0xff]  }
 0x3fa   : > { %3775 = vmatprep.subr.bf16.mxu1 %v5143_v35  ;;  %4573 = vmatpush3.bf16.msra.mxu0 %v5230_v10  ;;  %v5185_v35 = vld [vmem:[#allocation8 + $0x144] ss:$8 sps:$4 sm:$0xff]   ;;  %v3756_v10 = vrot.slane %v3431_v9, %v5665_v41  ;;  %v3881_v41 = vld [vmem:[%s5895_s20] sm:$0x1] }
 0x3fb   : > { %4574 = vmatprep.subr.bf16.mxu0 %v5231_v5 }
 0x3fd   : > { %3776 = vmatpush1.bf16.msra.mxu1 %v5141_v36  ;;  %v5183_v36 = vld [vmem:[#allocation8 + $0x140] ss:$8 sps:$4 sm:$0xff]  }
 0x3fe   : > { %3777 = vmatprep.subr.bf16.mxu1 %v5146_v37  ;;  %v5188_v37 = vld [vmem:[#allocation8 + $0x154] ss:$8 sps:$4 sm:$0xff]  }
 0x401   : > { %3778 = vmatpush1.bf16.msra.mxu1 %v5144_v38  ;;  %v5186_v38 = vld [vmem:[#allocation8 + $0x150] ss:$8 sps:$4 sm:$0xff]  }
 0x402   : > { %3779 = vmatprep.subr.bf16.mxu1 %v5149_v39  ;;  %v5191_v39 = vld [vmem:[#allocation8 + $0x164] ss:$8 sps:$4 sm:$0xff]  }
 0x405   : > { %3780 = vmatpush1.bf16.msra.mxu1 %v5147_v42  ;;  %v5189_v42 = vld [vmem:[#allocation8 + $0x160] ss:$8 sps:$4 sm:$0xff]  }
 0x406   : > { %3781 = vmatprep.subr.bf16.mxu1 %v5152_v43  ;;  %v5194_v43 = vld [vmem:[#allocation8 + $0x174] ss:$8 sps:$4 sm:$0xff]  }
 0x409   : > { %3782 = vmatpush1.bf16.msra.mxu1 %v5150_v44  ;;  %v5192_v44 = vld [vmem:[#allocation8 + $0x170] ss:$8 sps:$4 sm:$0xff]  }
 0x40a   : > { %3783 = vmatprep.subr.bf16.mxu1 %v5155_v45  ;;  %v5197_v45 = vld [vmem:[#allocation8 + $0x184] ss:$8 sps:$4 sm:$0xff]  }
 0x40d   : > { %3784 = vmatpush1.bf16.msra.mxu1 %v5153_v48  ;;  %v5195_v48 = vld [vmem:[#allocation8 + $0x180] ss:$8 sps:$4 sm:$0xff]  }
 0x40e   : > { %3785 = vmatprep.subr.bf16.mxu1 %v5158_v49  ;;  %v5200_v49 = vld [vmem:[#allocation8 + $0x194] ss:$8 sps:$4 sm:$0xff]  }
 0x411   : > { %3786 = vmatpush1.bf16.msra.mxu1 %v5156_v50  ;;  %v5198_v50 = vld [vmem:[#allocation8 + $0x190] ss:$8 sps:$4 sm:$0xff]  }
 0x412   : > { %3787 = vmatprep.subr.bf16.mxu1 %v5161_v52  ;;  %v5203_v52 = vld [vmem:[#allocation8 + $0x1a4] ss:$8 sps:$4 sm:$0xff]  }
 0x415   : > { %3788 = vmatpush1.bf16.msra.mxu1 %v5159_v54  ;;  %v5201_v54 = vld [vmem:[#allocation8 + $0x1a0] ss:$8 sps:$4 sm:$0xff]  }
 0x416   : > { %3789 = vmatprep.subr.bf16.mxu1 %v5164_v55  ;;  %v5206_v55 = vld [vmem:[#allocation8 + $0x1b4] ss:$8 sps:$4 sm:$0xff]  }
 0x419   : > { %3790 = vmatpush1.bf16.msra.mxu1 %v5162_v56  ;;  %v5204_v56 = vld [vmem:[#allocation8 + $0x1b0] ss:$8 sps:$4 sm:$0xff]  }
 0x41a   : > { %3791 = vmatprep.subr.bf16.mxu1 %v5167_v57  ;;  %v5209_v57 = vld [vmem:[#allocation8 + $0x1c4] ss:$8 sps:$4 sm:$0xff]  }
 0x41d   : > { %3792 = vmatpush1.bf16.msra.mxu1 %v5165_v58  ;;  %v5207_v58 = vld [vmem:[#allocation8 + $0x1c0] ss:$8 sps:$4 sm:$0xff]  }
 0x41e   : > { %3793 = vmatprep.subr.bf16.mxu1 %v5170_v59  ;;  %v5212_v59 = vld [vmem:[#allocation8 + $0x1d4] ss:$8 sps:$4 sm:$0xff]  }
 0x421   : > { %3794 = vmatpush1.bf16.msra.mxu1 %v5168_v60  ;;  %v5210_v60 = vld [vmem:[#allocation8 + $0x1d0] ss:$8 sps:$4 sm:$0xff]  }
 0x422   : > { %3804 = vmatprep.subr.bf16.mxu1 %v5173_v61  ;;  %v3022_v61 = vrot.slane %v5762_v14, %v5675_v47  ;;  %v5232_v47 = vld [vmem:[%s5858_s11 + $0x30] sm:$0xff]   ;;  %v3760_v14 = vrot.slane %v3431_v9, %v5672_v46 }
 0x423   : > { %4575 = vmatpush3.bf16.msra.mxu0 %v5232_v47 }
 0x424   : > { %4576 = vmatprep.subr.bf16.mxu0 %v5233_v6 }
 0x427   : > { %4577 = vmatpush3.bf16.msra.mxu0 %v5234_v7 }
 0x4b7   : > { %v3188_v18 = vpop.f32.mrb[4].mxu1 }
 0x4b8   : > { %v4596_v19 = vadd.f32 %v3188_v18, %v3014_v15  ;;  %v5770_v20 = vpop.f32.mrb[16].mxu0  ;;  %v3190_v21 = vpop.f32.mrb[5].mxu1 }
 0x4b9   : > { %v4597_v22 = vadd.f32 %v3190_v21, %v3018_v16  ;;  %v3354_v8 = vpop.f32.mrb[17].mxu0  ;;  %v3192_v23 = vpop.f32.mrb[6].mxu1  ;;  %v4598_v63 = vadd.f32 %v5770_v20, %v3022_v61 }
 0x4ba   : > { %v3359_v24 = vmax.f32 %v4596_v19, 0.0  ;;  %v4599_v25 = vadd.f32 %v3354_v8, %v3026_v17  ;;  %v3356_v26 = vpop.f32.mrb[18].mxu0  ;;  %v3193_v27 = vpop.f32.mrb[7].mxu1 }
 0x4bb   : > { %v3360_v28 = vmax.f32 %v4597_v22, 0.0  ;;  %v3357_v29 = vpop.f32.mrb[19].mxu0  ;;  %v3361_v3 = vmax.f32 %v4598_v63, 0.0 }
 0x4bc   : > { %v3362_v30 = vmax.f32 %v4599_v25, 0.0  ;;  %v3363_v32 = vpack.c.bf16 %v3359_v24, %v3359_v24 }
 0x4bd   : > { %v3364_v40 = vpack.c.bf16 %v3360_v28, %v3360_v28  ;;  %v3365_v4 = vpack.c.bf16 %v3361_v3, %v3361_v3 }
 0x4be   : > { %v3366_v53 = vpack.c.bf16 %v3362_v30, %v3362_v30 }
 0x4bf   : > { %3795 = vmatprep.mubr.bf16.mxu1 %v3364_v40 }
 0x4c0   : > { %3796 = vmatmul.mubr.bf16.vlgmr.msra.gmra.mrb[8].mxu1 %v3363_v32 }
 0x4c1   : > { %3805 = vmatpush1.bf16.msra.mxu1 %v5171_v31  ;;  %3836 = vmatprep.mubr.bf16.mxu1 %v3366_v53 }
 0x4c2   : > { %3806 = vmatprep.subr.bf16.mxu1 %v5176_v33 }
 0x4c5   : > { %3807 = vmatpush1.bf16.msra.mxu1 %v5174_v51 }
 0x4c6   : > { %3808 = vmatprep.subr.bf16.mxu1 %v5179_v11 }
 0x4c9   : > { %3809 = vmatpush1.bf16.msra.mxu1 %v5177_v12 }
 0x4ca   : > { %3810 = vmatprep.subr.bf16.mxu1 %v5182_v13 }
 0x4cd   : > { %3811 = vmatpush1.bf16.msra.mxu1 %v5180_v34 }
 0x4ce   : > { %3812 = vmatprep.subr.bf16.mxu1 %v5185_v35 }
 0x4d1   : > { %3813 = vmatpush1.bf16.msra.mxu1 %v5183_v36 }
 0x4d2   : > { %3814 = vmatprep.subr.bf16.mxu1 %v5188_v37 }
 0x4d5   : > { %3815 = vmatpush1.bf16.msra.mxu1 %v5186_v38 }
 0x4d6   : > { %3816 = vmatprep.subr.bf16.mxu1 %v5191_v39 }
 0x4d9   : > { %3817 = vmatpush1.bf16.msra.mxu1 %v5189_v42 }
 0x4da   : > { %3818 = vmatprep.subr.bf16.mxu1 %v5194_v43 }
 0x4dd   : > { %3819 = vmatpush1.bf16.msra.mxu1 %v5192_v44 }
 0x4de   : > { %3820 = vmatprep.subr.bf16.mxu1 %v5197_v45 }
 0x4e1   : > { %3821 = vmatpush1.bf16.msra.mxu1 %v5195_v48 }
 0x4e2   : > { %3822 = vmatprep.subr.bf16.mxu1 %v5200_v49 }
 0x4e5   : > { %3823 = vmatpush1.bf16.msra.mxu1 %v5198_v50 }
 0x4e6   : > { %3824 = vmatprep.subr.bf16.mxu1 %v5203_v52 }
 0x4e9   : > { %3825 = vmatpush1.bf16.msra.mxu1 %v5201_v54 }
 0x4ea   : > { %3826 = vmatprep.subr.bf16.mxu1 %v5206_v55 }
 0x4ed   : > { %3827 = vmatpush1.bf16.msra.mxu1 %v5204_v56 }
 0x4ee   : > { %3828 = vmatprep.subr.bf16.mxu1 %v5209_v57 }
 0x4f1   : > { %3829 = vmatpush1.bf16.msra.mxu1 %v5207_v58 }
 0x4f2   : > { %3830 = vmatprep.subr.bf16.mxu1 %v5212_v59 }
 0x4f5   : > { %3831 = vmatpush1.bf16.msra.mxu1 %v5210_v60 }
 0x4f6   : > { %3832 = vmatprep.subr.bf16.mxu1 %v5215_v1 }
 0x4f9   : > { %3833 = vmatpush1.bf16.msra.mxu1 %v5213_v62 }
 0x4fa   : > { %3834 = vmatprep.subr.bf16.mxu1 %v5218_v0 }
 0x4fd   : > { %3835 = vmatpush1.bf16.msra.mxu1 %v5216_v2 }
 0x500   : > { %3837 = vmatmul.mubr.bf16.vlgmr.msra.gmra.mrb[8].mxu1 %v3365_v4 }
 0x5d3   : > { %v3838_v15 = vpop.f32.mrb[8].mxu1 }
 0x5d4   : > { %v4600_v16 = vadd.f32 %v3838_v15, %v3756_v10  ;;  %v3840_v17 = vpop.f32.mrb[9].mxu1 }
 0x5d5   : > { %v4601_v18 = vadd.f32 %v3840_v17, %v3760_v14  ;;  %v3842_v19 = vpop.f32.mrb[10].mxu1 }
 0x5d6   : > { %v3845_v20 = vmax.f32 %v4600_v16, 0.0  ;;  %v3843_v21 = vpop.f32.mrb[11].mxu1 }
 0x5d7   : > { %v3846_v22 = vmax.f32 %v4601_v18, 0.0 }
 0x5d8   : > { %v3847_v23 = vpack.c.bf16 %v3845_v20, %v3845_v20 }
 0x5d9   : > { %v3848_v8 = vpack.c.bf16 %v3846_v22, %v3846_v22 }
 0x5db   : > { %4010 = vmatprep.mubr.bf16.mxu0 %v3848_v8 }
 0x5dc   : > { %4011 = vmatmul.mubr.bf16.vlgmr.msra.gmra.mrb[20].mxu0 %v3847_v23 }
 0x6af   : > { %v4578_v24 = vpop.f32.mrb[20].mxu0 }
 0x6b0   : > { %v4579_v46 = vpop.f32.mrb[21].mxu0 }
 0x6b1   : > { %v4580_v25 = vadd.f32 %v4579_v46, %v4578_v24  ;;  %v4581_v26 = vpop.f32.mrb[22].mxu0 }
 0x6b2   : > { %v4582_v27 = vpop.f32.mrb[23].mxu0 }
 0x6b3   : > { %v4013_v28 = vadd.f32 %v4580_v25, %v3881_v41 }
 0x6b5   : > { %4019 = vst.msk [vmem:[%s499_s17] sm:$0x1] %vm4018_vm2, %v4013_v28 }
 0x6b6   : > { %5332 = shalt.err (!%p5329_p6)
}
 0x6b7   : > { %s5333_s19 = scalar_lea.hbm %s5800_s13, 16  ;;  %s5337_s27 = scalar_lea.hbm %s5897_s16, 32 }
 0x6b8   : > { %p5334_p7 = scmp.ne.s32.totalorder %s5800_s13, %s5333_s19  ;;  %p5338_p4 = scmp.lt.u32.totalorder %s5800_s13, %s5897_s16 }
 0x6b9   : > { %p5339_p8 = scmp.lt.u32.totalorder %s5337_s27, %s5333_s19  ;;  %p5341_p13 = scmp.lt.u32.totalorder %s5333_s19, %s5800_s13 }
 0x6ba   : > { %p5335_p9 = pnand %p5334_p7, %p5898_p10 }
 0x6bb   : > { %p5340_p1 = por %p5339_p8, %p5338_p4 }
 0x6bc   : > { %p5336_p12 = pneg %p5335_p9 }
 0x6bd   : > { %p5342_p11 = por %p5341_p13, %p5340_p1 }
 0x6bf   : > { %p5343_p0 = pnand %p5342_p11, %p5336_p12 }
 0x6c1   : > { %5346 = shalt.err (!%p5343_p0)
}
 0x6c2   : > { %4642 = dma.vmem_to_hbm [thread:$0]  (%p5898_p10), %s5802_s14, 16, %s5800_s13, %s4021_s18  }
 0x6c3 PF: > { %s5899_s21 = sld [smem:[#allocation16_spill]]  ;;  %s5900_s17 = sld [smem:[#allocation13_spill]] }
 0x6c4   : > { %s5901_s29 = sld [smem:[#allocation19_spill]] }
 0x6c9   : > { %p4664_p2 = scmp.ge.s32.totalorder %s5899_s21, 2  ;;  %s4045_s25 = sand.u32 1, %s5900_s17  }
 0x6ca   : > { %p5902_p3 = scmp.ne.s32.totalorder %s5901_s29, 0  ;;  %s4046_s28 = scalar_lea.sflag [#allocation5], %s4045_s25 }
 0x6cc   : > { %p4655_p5 = pnand %p4664_p2, %p5902_p3 }
 0x6ce   : > { %5380 = dma.done.wait (!%p4655_p5), %s4046_s28, 16  }
 0x6cf   : > { %5382 = vsyncadd (!%p4655_p5), %s4046_s28, 4294967280  ;;  %s28_s30 = sadd.s32 1, %s5899_s21   ;;  %s5903_s12 = sld [smem:[#allocation14_spill]] }
 0x6d0   : > { %p25_p6 = scmp.ge.s32.totalorder %s28_s30, 4   ;;  %s5904_s27 = sld [smem:[#allocation20_spill]] }
 0x6d1   : > { %s5905_s28 = sld [smem:[#allocation15_spill]]  ;;  %s5906_s29 = sld [smem:[#allocation17_spill]] }
 0x6d2   : > { %s5907_s25 = smov %s5389_s26  ;;  %27 = sbr.rel (!%p25_p6) target bundleno = 10 (0xa), region = 132 }
 0x6d5   : > { %s5908_s26 = smov %s5903_s12 }
 0x6d9   :  { %4050 = vsyncpa [#allocation4], 1 }
 0x6da   :  { %4052 = vsyncpa [#allocation4 + $0x1], 1 }
 0x6db   :  { %4053 = vsyncpa [#allocation7], 1 }
 0x6dc   :  { %4054 = vsyncpa [#allocation5], 1 }
 0x6dd   :  { %4056 = vsyncpa [#allocation5 + $0x1], 1 }

</bundles_post_ra>
